<compile_context>
chip_gen: v7x
topology: tpu7x:2x2x1
jax: 0.10.0
libtpu: 0.0.40
codegen_flags: <defaults>
</compile_context>

<pallas_src>
import numpy as np
import jax
import jax.numpy as jnp
from jax.experimental import pallas as pl
from jax.experimental.pallas import tpu as pltpu

# ---- static network dimensions (from MNISTNet.__init__ / forward) ----------
N = 2                                   # demo batch
H_IN = W_IN = 28
C_IN = 1
C1, C2, KS = 8, 16, 3
H1 = W1 = H_IN - KS + 1                 # 26   conv1 out
HP1 = WP1 = H1 // 2                     # 13   pool1 out
H2 = W2 = HP1 - KS + 1                  # 11   conv2 out
HP2 = WP2 = H2 // 2                     # 5    pool2 out (floor)
F_HID, N_CLS, PAD_CLS = 32, 10, 128
BN_EPS = 1e-5
NEG_INF = -1e30

# ---- derived lane-dense layout constants ------------------------------------
A_K      = KS * W_IN                    # 84   conv1 matmul K
Y1_LANES = W1 * C1                      # 208  conv1 out lanes  (w*8 + c)
T1_ROWS  = H1 - 1                       # 25   pool1 rows (valid = even rows)
T1_LANES = (W1 - 1) * C1                # 200  pool1 lanes (valid = even 8-blocks)
B_K      = KS * T1_LANES                # 600  conv2 matmul K
Y2_ROWS  = 2 * H2 - 1                   # 21   conv2 rows (valid = even rows)
Y2_LANES = W2 * C2                      # 176  conv2 lanes  (w2*16 + c2)
T2_ROWS  = Y2_ROWS - 2                  # 19   pool2 rows (valid = 0,4,8,12,16)
T2_LANES = (W2 - 1) * C2                # 160  pool2 lanes (valid = even 16-blocks)
F_K      = HP2 * T2_LANES               # 800  fc1 matmul K


def mnist_kernel(x_ref,                 # (28, 28) f32 — one image per grid step
                 w1_ref, b1_ref,        # (84, 208) bf16, (1, 208) f32
                 w2_ref, b2_ref,        # (600,176) bf16, (1, 176) f32
                 wf1_ref, bf1_ref,      # (800, 32) bf16, (1, 32)  f32
                 wf2_ref, bf2_ref,      # (32, 128) bf16, (1, 128) f32 (-1e30 pad)
                 out_ref):              # (1, 128)  f32
    x = x_ref[...]

    # ---- conv1 + folded BN: one banded MXU matmul + relu --------------------
    a = jnp.concatenate([x[dy:dy + H1, :] for dy in range(KS)], axis=-1)  # (26,84)
    y1 = jnp.dot(a.astype(jnp.bfloat16), w1_ref[...],
                 preferred_element_type=jnp.float32)                      # (26,208)
    y1 = jnp.maximum(y1 + b1_ref[...], 0.0)

    # ---- max_pool2d(2): shifted maxima; decimation folded into conv2 weights
    t1 = jnp.maximum(y1[:H1 - 1, :], y1[1:H1, :])                         # (25,208)
    t1 = jnp.maximum(t1[:, :T1_LANES], t1[:, C1:C1 + T1_LANES])           # (25,200)

    # ---- conv2 + folded BN: one banded MXU matmul + relu --------------------
    b = jnp.concatenate([t1[2 * dy: 2 * dy + Y2_ROWS, :] for dy in range(KS)],
                        axis=-1)                                          # (21,600)
    y2 = jnp.dot(b.astype(jnp.bfloat16), w2_ref[...],
                 preferred_element_type=jnp.float32)                      # (21,176)
    y2 = jnp.maximum(y2 + b2_ref[...], 0.0)

    # ---- max_pool2d(2): shifted maxima; decimation folded into fc1 weights --
    t2 = jnp.maximum(y2[:T2_ROWS, :], y2[2:2 + T2_ROWS, :])               # (19,176)
    t2 = jnp.maximum(t2[:, :T2_LANES], t2[:, C2:C2 + T2_LANES])           # (19,160)

    # ---- flatten: lane-concat the 5 valid pool2 rows into one feature row ---
    f = jnp.concatenate([t2[4 * i: 4 * i + 1, :] for i in range(HP2)],
                        axis=-1)                                          # (1,800)

    # ---- fc1 + relu ----------------------------------------------------------
    h = jnp.dot(f.astype(jnp.bfloat16), wf1_ref[...],
                preferred_element_type=jnp.float32)
    h = jnp.maximum(h + bf1_ref[...], 0.0)                                # (1,32)

    # Dropout(p=0.05): identity in eval mode.
    # TODO(synk): training-mode dropout mask (pltpu.prng_*) not implemented.

    # ---- fc2 (classes padded to 128 lanes) + log_softmax (all f32) ----------
    logits = jnp.dot(h.astype(jnp.bfloat16), wf2_ref[...],
                     preferred_element_type=jnp.float32) + bf2_ref[...]   # (1,128)
    mx = jnp.max(logits, axis=-1, keepdims=True)
    s = logits - mx
    lse = jnp.log(jnp.sum(jnp.exp(s), axis=-1, keepdims=True))
    out_ref[...] = s - lse


def pack_params(params):
    """Fold eval-mode BN into the convs and pack all weights into the banded,
    lane-dense bf16 matrices the kernel consumes.  Runs ONCE, outside jit."""
    (w1, b1, g1, be1, rm1, rv1,
     w2, b2, g2, be2, rm2, rv2,
     wf1, bf1, wf2, bf2) = [np.asarray(p, np.float32) for p in params]

    s1 = g1 / np.sqrt(rv1 + BN_EPS)
    w1f = w1 * s1[:, None, None, None]                       # (8,1,3,3)
    b1f = (b1 - rm1) * s1 + be1
    s2 = g2 / np.sqrt(rv2 + BN_EPS)
    w2f = w2 * s2[:, None, None, None]                       # (16,8,3,3)
    b2f = (b2 - rm2) * s2 + be2

    # conv1 banded weight: A[h, dy*28+j] = x[h+dy, j];  y1[h, w*8+c].
    w1p = np.zeros((A_K, Y1_LANES), np.float32)
    for dy in range(KS):
        for dx in range(KS):
            for w in range(W1):
                w1p[dy * W_IN + w + dx, w * C1:(w + 1) * C1] = w1f[:, 0, dy, dx]
    b1p = np.tile(b1f, W1)[None, :]                           # (1,208)

    # conv2 banded weight: B[m, dy*200+l] = t1[m+2dy, l], t1 lane l = 16*w'+c1;
    # valid y2 rows m = 2*h2, lanes w2*16+c2.  Odd-block (garbage) lanes of t1
    # get zero rows — the MXU does the pool-decimation masking for free.
    w2p = np.zeros((B_K, Y2_LANES), np.float32)
    for dy in range(KS):
        for dx in range(KS):
            for w2c in range(W2):
                r = dy * T1_LANES + 2 * C1 * (w2c + dx)
                w2p[r:r + C1, w2c * C2:(w2c + 1) * C2] = w2f[:, :, dy, dx].T
    b2p = np.tile(b2f, W2)[None, :]                           # (1,176)

    # fc1 weight on the lane-concatenated feature row:
    # F[0, i*160 + 32*wp + c2] = p2[c2, i, wp]; torch flatten idx = c2*25+i*5+wp.
    wf1p = np.zeros((F_K, F_HID), np.float32)
    for i in range(HP2):
        for wp in range(WP2):
            cols = np.arange(C2) * (HP2 * WP2) + i * WP2 + wp
            row = i * T2_LANES + 2 * C2 * wp
            wf1p[row:row + C2, :] = wf1[:, cols].T
    bf1p = bf1[None, :]                                       # (1,32)

    # fc2 padded to 128 classes; pad-lane bias = -1e30 kept in f32.
    wf2p = np.zeros((F_HID, PAD_CLS), np.float32)
    wf2p[:, :N_CLS] = wf2.T
    bf2p = np.full((1, PAD_CLS), NEG_INF, np.float32)
    bf2p[0, :N_CLS] = bf2

    return (jnp.asarray(w1p, jnp.bfloat16), jnp.asarray(b1p),
            jnp.asarray(w2p, jnp.bfloat16), jnp.asarray(b2p),
            jnp.asarray(wf1p, jnp.bfloat16), jnp.asarray(bf1p),
            jnp.asarray(wf2p, jnp.bfloat16), jnp.asarray(bf2p))


@jax.jit
def mnist_pallas(x_nchw, packed):
    (w1p, b1p, w2p, b2p, wf1p, bf1p, wf2p, bf2p) = packed
    x = x_nchw[:, 0, :, :].astype(jnp.float32)                # (n, 28, 28)
    n = x.shape[0]

    flops = 2 * n * (H1 * A_K * Y1_LANES + Y2_ROWS * B_K * Y2_LANES
                     + F_K * F_HID + F_HID * PAD_CLS)
    bytes_accessed = (x.size * 4 + n * PAD_CLS * 4
                      + sum(int(np.prod(p.shape)) * p.dtype.itemsize
                            for p in packed))

    def full(arr):       # whole weight resident; constant index_map across batch
        return pl.BlockSpec(arr.shape, lambda b: (0, 0))

    out = pl.pallas_call(
        mnist_kernel,
        out_shape=jax.ShapeDtypeStruct((n, 1, PAD_CLS), jnp.float32),
        grid=(n,),
        in_specs=[pl.BlockSpec((None, H_IN, W_IN), lambda b: (b, 0, 0)),
                  full(w1p), full(b1p), full(w2p), full(b2p),
                  full(wf1p), full(bf1p), full(wf2p), full(bf2p)],
        out_specs=pl.BlockSpec((None, 1, PAD_CLS), lambda b: (b, 0, 0)),
        compiler_params=pltpu.CompilerParams(
            dimension_semantics=("parallel",)),
        cost_estimate=pl.CostEstimate(flops=flops,
                                      transcendentals=n * (PAD_CLS + 1),
                                      bytes_accessed=bytes_accessed),
    )(x, *packed)
    return out.reshape(n, PAD_CLS)[:, :N_CLS]


def mnist_reference(x_nchw, params):
    """Pure-JAX f32 reference matching the PyTorch module (eval mode)."""
    (w1, b1, g1, be1, rm1, rv1,
     w2, b2, g2, be2, rm2, rv2,
     wf1, bf1, wf2, bf2) = [p.astype(jnp.float32) for p in params]
    hi = jax.lax.Precision.HIGHEST
    dn = ("NCHW", "OIHW", "NCHW")

    def bn(y, g, be, rm, rv):
        sc = (g * jax.lax.rsqrt(rv + BN_EPS)).reshape(1, -1, 1, 1)
        return (y - rm.reshape(1, -1, 1, 1)) * sc + be.reshape(1, -1, 1, 1)

    x = x_nchw.astype(jnp.float32)
    y = jax.lax.conv_general_dilated(x, w1, (1, 1), "VALID",
                                     dimension_numbers=dn, precision=hi)
    y = jnp.maximum(bn(y + b1.reshape(1, -1, 1, 1), g1, be1, rm1, rv1), 0.0)
    y = jax.lax.reduce_window(y, -jnp.inf, jax.lax.max,
                              (1, 1, 2, 2), (1, 1, 2, 2), "VALID")
    y = jax.lax.conv_general_dilated(y, w2, (1, 1), "VALID",
                                     dimension_numbers=dn, precision=hi)
    y = jnp.maximum(bn(y + b2.reshape(1, -1, 1, 1), g2, be2, rm2, rv2), 0.0)
    y = jax.lax.reduce_window(y, -jnp.inf, jax.lax.max,
                              (1, 1, 2, 2), (1, 1, 2, 2), "VALID")
    feats = y.reshape(y.shape[0], -1)                 # NCHW flatten = (c,h,w)
    h = jnp.maximum(jnp.dot(feats, wf1.T, precision=hi) + bf1, 0.0)
    logits = jnp.dot(h, wf2.T, precision=hi) + bf2
    return jax.nn.log_softmax(logits, axis=1)


def make_params(key):
    """PyTorch-shaped parameters with non-trivial eval-mode BN statistics."""
    ks = jax.random.split(key, 16)

    def u(k, shape, fan_in):
        bound = 1.0 / (fan_in ** 0.5)
        return jax.random.uniform(k, shape, jnp.float32, -bound, bound)

    w1 = u(ks[0], (C1, C_IN, KS, KS), C_IN * KS * KS)
    b1 = u(ks[1], (C1,), C_IN * KS * KS)
    w2 = u(ks[2], (C2, C1, KS, KS), C1 * KS * KS)
    b2 = u(ks[3], (C2,), C1 * KS * KS)
    wf1 = u(ks[4], (F_HID, C2 * HP2 * WP2), C2 * HP2 * WP2)
    bf1 = u(ks[5], (F_HID,), C2 * HP2 * WP2)
    wf2 = u(ks[6], (N_CLS, F_HID), F_HID)
    bf2 = u(ks[7], (N_CLS,), F_HID)

    g1 = 1.0 + 0.1 * jax.random.normal(ks[8], (C1,), jnp.float32)
    be1 = 0.1 * jax.random.normal(ks[9], (C1,), jnp.float32)
    rm1 = 0.1 * jax.random.normal(ks[10], (C1,), jnp.float32)
    rv1 = jax.random.uniform(ks[11], (C1,), jnp.float32, 0.5, 1.5)
    g2 = 1.0 + 0.1 * jax.random.normal(ks[12], (C2,), jnp.float32)
    be2 = 0.1 * jax.random.normal(ks[13], (C2,), jnp.float32)
    rm2 = 0.1 * jax.random.normal(ks[14], (C2,), jnp.float32)
    rv2 = jax.random.uniform(ks[15], (C2,), jnp.float32, 0.5, 1.5)

    return (w1, b1, g1, be1, rm1, rv1,
            w2, b2, g2, be2, rm2, rv2,
            wf1, bf1, wf2, bf2)


if __name__ == "__main__":
    root = jax.random.PRNGKey(0)
    k_params, k_x = jax.random.split(root)
    params = make_params(k_params)
    x = jax.random.normal(k_x, (N, C_IN, H_IN, W_IN), jnp.float32)  # NCHW input

    packed = pack_params(params)          # hoisted: runs once, outside jit
    out = jax.block_until_ready(mnist_pallas(x, packed))
    assert out.shape == (N, N_CLS)

    ref = mnist_reference(x, params)
    err = float(jnp.max(jnp.abs(out - ref)))
    # bf16 MXU operands (f32 accumulation) -> expected max |err| ~5e-3 on these
    # log-probs; 3e-2 still cleanly catches layout/packing bugs (those are O(0.5+)).
    if not (err < 3e-2):
        raise AssertionError(f"kernel/reference mismatch, max abs err={err}")
    print("KERNEL_OK")
</pallas_src>

<mosaic_0001>
module attributes {stable_mosaic.version = 11 : i64} {
  func.func @mnist_kernel(%arg0: i32, %arg1: memref<1x28x28xf32, #tpu.memory_space<vmem>>, %arg2: memref<84x208xbf16, #tpu.memory_space<vmem>>, %arg3: memref<1x208xf32, #tpu.memory_space<vmem>>, %arg4: memref<600x176xbf16, #tpu.memory_space<vmem>>, %arg5: memref<1x176xf32, #tpu.memory_space<vmem>>, %arg6: memref<800x32xbf16, #tpu.memory_space<vmem>>, %arg7: memref<1x32xf32, #tpu.memory_space<vmem>>, %arg8: memref<32x128xbf16, #tpu.memory_space<vmem>>, %arg9: memref<1x128xf32, #tpu.memory_space<vmem>>, %arg10: memref<1x1x128xf32, #tpu.memory_space<vmem>>) attributes {dimension_semantics = [#tpu.dimension_semantics<parallel>], iteration_bounds = array<i64: 2>, scalar_prefetch = 0 : i64, scratch_operands = 0 : i64, tpu.core_type = #tpu.core_type<tc>, window_params = [{transform_indices = @transform_0, window_bounds = array<i64: 1, 28, 28>}, {pipeline_mode = #tpu.pipeline_mode<synchronous>, transform_indices = @transform_1, window_bounds = array<i64: 84, 208>}, {pipeline_mode = #tpu.pipeline_mode<synchronous>, transform_indices = @transform_2, window_bounds = array<i64: 1, 208>}, {pipeline_mode = #tpu.pipeline_mode<synchronous>, transform_indices = @transform_3, window_bounds = array<i64: 600, 176>}, {pipeline_mode = #tpu.pipeline_mode<synchronous>, transform_indices = @transform_4, window_bounds = array<i64: 1, 176>}, {pipeline_mode = #tpu.pipeline_mode<synchronous>, transform_indices = @transform_5, window_bounds = array<i64: 800, 32>}, {pipeline_mode = #tpu.pipeline_mode<synchronous>, transform_indices = @transform_6, window_bounds = array<i64: 1, 32>}, {pipeline_mode = #tpu.pipeline_mode<synchronous>, transform_indices = @transform_7, window_bounds = array<i64: 32, 128>}, {pipeline_mode = #tpu.pipeline_mode<synchronous>, transform_indices = @transform_8, window_bounds = array<i64: 1, 128>}, {transform_indices = @transform_9, window_bounds = array<i64: 1, 1, 128>}]} {
    %c0 = arith.constant 0 : index
    %c0_0 = arith.constant 0 : index
    %c0_1 = arith.constant 0 : index
    %0 = vector.load %arg1[%c0, %c0_0, %c0_1] : memref<1x28x28xf32, #tpu.memory_space<vmem>>, vector<1x28x28xf32>
    %1 = vector.shape_cast %0 : vector<1x28x28xf32> to vector<28x28xf32>
    %2 = vector.extract_strided_slice %1 {offsets = [0, 0], sizes = [26, 28], strides = [1, 1]} : vector<28x28xf32> to vector<26x28xf32>
    %3 = vector.extract_strided_slice %1 {offsets = [1, 0], sizes = [26, 28], strides = [1, 1]} : vector<28x28xf32> to vector<26x28xf32>
    %4 = vector.extract_strided_slice %1 {offsets = [2, 0], sizes = [26, 28], strides = [1, 1]} : vector<28x28xf32> to vector<26x28xf32>
    %5 = tpu.concatenate %2, %3, %4 in 1 : vector<26x28xf32>, vector<26x28xf32>, vector<26x28xf32> -> vector<26x84xf32>
    %6 = arith.truncf %5 : vector<26x84xf32> to vector<26x84xbf16>
    %c0_2 = arith.constant 0 : index
    %c0_3 = arith.constant 0 : index
    %7 = vector.load %arg2[%c0_2, %c0_3] : memref<84x208xbf16, #tpu.memory_space<vmem>>, vector<84x208xbf16>
    %cst = arith.constant dense<0.000000e+00> : vector<26x208xf32>
    %8 = tpu.matmul %6, %7, %cst {dimension_numbers = #tpu.dot_dimension_numbers<[1], [0], [0], [1], [0, 0, 1, 1], [], []>} : vector<26x84xbf16>, vector<84x208xbf16>, vector<26x208xf32> -> vector<26x208xf32>
    %c0_4 = arith.constant 0 : index
    %c0_5 = arith.constant 0 : index
    %9 = vector.load %arg3[%c0_4, %c0_5] : memref<1x208xf32, #tpu.memory_space<vmem>>, vector<1x208xf32>
    %10 = vector.broadcast %9 : vector<1x208xf32> to vector<26x208xf32>
    %11 = arith.addf %8, %10 : vector<26x208xf32>
    %cst_6 = arith.constant 0.000000e+00 : f32
    %12 = vector.broadcast %cst_6 : f32 to vector<26x208xf32>
    %13 = arith.maximumf %11, %12 : vector<26x208xf32>
    %14 = vector.extract_strided_slice %13 {offsets = [0, 0], sizes = [25, 208], strides = [1, 1]} : vector<26x208xf32> to vector<25x208xf32>
    %15 = vector.extract_strided_slice %13 {offsets = [1, 0], sizes = [25, 208], strides = [1, 1]} : vector<26x208xf32> to vector<25x208xf32>
    %16 = arith.maximumf %14, %15 : vector<25x208xf32>
    %17 = vector.extract_strided_slice %16 {offsets = [0, 0], sizes = [25, 200], strides = [1, 1]} : vector<25x208xf32> to vector<25x200xf32>
    %18 = vector.extract_strided_slice %16 {offsets = [0, 8], sizes = [25, 200], strides = [1, 1]} : vector<25x208xf32> to vector<25x200xf32>
    %19 = arith.maximumf %17, %18 : vector<25x200xf32>
    %20 = vector.extract_strided_slice %19 {offsets = [0, 0], sizes = [21, 200], strides = [1, 1]} : vector<25x200xf32> to vector<21x200xf32>
    %21 = vector.extract_strided_slice %19 {offsets = [2, 0], sizes = [21, 200], strides = [1, 1]} : vector<25x200xf32> to vector<21x200xf32>
    %22 = vector.extract_strided_slice %19 {offsets = [4, 0], sizes = [21, 200], strides = [1, 1]} : vector<25x200xf32> to vector<21x200xf32>
    %23 = tpu.concatenate %20, %21, %22 in 1 : vector<21x200xf32>, vector<21x200xf32>, vector<21x200xf32> -> vector<21x600xf32>
    %24 = arith.truncf %23 : vector<21x600xf32> to vector<21x600xbf16>
    %c0_7 = arith.constant 0 : index
    %c0_8 = arith.constant 0 : index
    %25 = vector.load %arg4[%c0_7, %c0_8] : memref<600x176xbf16, #tpu.memory_space<vmem>>, vector<600x176xbf16>
    %cst_9 = arith.constant dense<0.000000e+00> : vector<21x176xf32>
    %26 = tpu.matmul %24, %25, %cst_9 {dimension_numbers = #tpu.dot_dimension_numbers<[1], [0], [0], [1], [0, 0, 1, 1], [], []>} : vector<21x600xbf16>, vector<600x176xbf16>, vector<21x176xf32> -> vector<21x176xf32>
    %c0_10 = arith.constant 0 : index
    %c0_11 = arith.constant 0 : index
    %27 = vector.load %arg5[%c0_10, %c0_11] : memref<1x176xf32, #tpu.memory_space<vmem>>, vector<1x176xf32>
    %28 = vector.broadcast %27 : vector<1x176xf32> to vector<21x176xf32>
    %29 = arith.addf %26, %28 : vector<21x176xf32>
    %cst_12 = arith.constant 0.000000e+00 : f32
    %30 = vector.broadcast %cst_12 : f32 to vector<21x176xf32>
    %31 = arith.maximumf %29, %30 : vector<21x176xf32>
    %32 = vector.extract_strided_slice %31 {offsets = [0, 0], sizes = [19, 176], strides = [1, 1]} : vector<21x176xf32> to vector<19x176xf32>
    %33 = vector.extract_strided_slice %31 {offsets = [2, 0], sizes = [19, 176], strides = [1, 1]} : vector<21x176xf32> to vector<19x176xf32>
    %34 = arith.maximumf %32, %33 : vector<19x176xf32>
    %35 = vector.extract_strided_slice %34 {offsets = [0, 0], sizes = [19, 160], strides = [1, 1]} : vector<19x176xf32> to vector<19x160xf32>
    %36 = vector.extract_strided_slice %34 {offsets = [0, 16], sizes = [19, 160], strides = [1, 1]} : vector<19x176xf32> to vector<19x160xf32>
    %37 = arith.maximumf %35, %36 : vector<19x160xf32>
    %38 = vector.extract_strided_slice %37 {offsets = [0, 0], sizes = [1, 160], strides = [1, 1]} : vector<19x160xf32> to vector<1x160xf32>
    %39 = vector.extract_strided_slice %37 {offsets = [4, 0], sizes = [1, 160], strides = [1, 1]} : vector<19x160xf32> to vector<1x160xf32>
    %40 = vector.extract_strided_slice %37 {offsets = [8, 0], sizes = [1, 160], strides = [1, 1]} : vector<19x160xf32> to vector<1x160xf32>
    %41 = vector.extract_strided_slice %37 {offsets = [12, 0], sizes = [1, 160], strides = [1, 1]} : vector<19x160xf32> to vector<1x160xf32>
    %42 = vector.extract_strided_slice %37 {offsets = [16, 0], sizes = [1, 160], strides = [1, 1]} : vector<19x160xf32> to vector<1x160xf32>
    %43 = tpu.concatenate %38, %39, %40, %41, %42 in 1 : vector<1x160xf32>, vector<1x160xf32>, vector<1x160xf32>, vector<1x160xf32>, vector<1x160xf32> -> vector<1x800xf32>
    %44 = arith.truncf %43 : vector<1x800xf32> to vector<1x800xbf16>
    %c0_13 = arith.constant 0 : index
    %c0_14 = arith.constant 0 : index
    %45 = vector.load %arg6[%c0_13, %c0_14] : memref<800x32xbf16, #tpu.memory_space<vmem>>, vector<800x32xbf16>
    %cst_15 = arith.constant dense<0.000000e+00> : vector<1x32xf32>
    %46 = tpu.matmul %44, %45, %cst_15 {dimension_numbers = #tpu.dot_dimension_numbers<[1], [0], [0], [1], [0, 0, 1, 1], [], []>} : vector<1x800xbf16>, vector<800x32xbf16>, vector<1x32xf32> -> vector<1x32xf32>
    %c0_16 = arith.constant 0 : index
    %c0_17 = arith.constant 0 : index
    %47 = vector.load %arg7[%c0_16, %c0_17] : memref<1x32xf32, #tpu.memory_space<vmem>>, vector<1x32xf32>
    %48 = arith.addf %46, %47 : vector<1x32xf32>
    %cst_18 = arith.constant 0.000000e+00 : f32
    %49 = vector.broadcast %cst_18 : f32 to vector<1x32xf32>
    %50 = arith.maximumf %48, %49 : vector<1x32xf32>
    %51 = arith.truncf %50 : vector<1x32xf32> to vector<1x32xbf16>
    %c0_19 = arith.constant 0 : index
    %c0_20 = arith.constant 0 : index
    %52 = vector.load %arg8[%c0_19, %c0_20] : memref<32x128xbf16, #tpu.memory_space<vmem>>, vector<32x128xbf16>
    %cst_21 = arith.constant dense<0.000000e+00> : vector<1x128xf32>
    %53 = tpu.matmul %51, %52, %cst_21 {dimension_numbers = #tpu.dot_dimension_numbers<[1], [0], [0], [1], [0, 0, 1, 1], [], []>} : vector<1x32xbf16>, vector<32x128xbf16>, vector<1x128xf32> -> vector<1x128xf32>
    %c0_22 = arith.constant 0 : index
    %c0_23 = arith.constant 0 : index
    %54 = vector.load %arg9[%c0_22, %c0_23] : memref<1x128xf32, #tpu.memory_space<vmem>>, vector<1x128xf32>
    %55 = arith.addf %53, %54 : vector<1x128xf32>
    %cst_24 = arith.constant dense<0xFF800000> : vector<1xf32>
    %56 = vector.multi_reduction <maximumf>, %55, %cst_24 [1] : vector<1x128xf32> to vector<1xf32>
    %57 = vector.shape_cast %56 : vector<1xf32> to vector<1x1xf32>
    %58 = vector.broadcast %57 : vector<1x1xf32> to vector<1x128xf32>
    %59 = arith.subf %55, %58 : vector<1x128xf32>
    %60 = math.exp %59 : vector<1x128xf32>
    %cst_25 = arith.constant dense<0.000000e+00> : vector<1xf32>
    %61 = vector.multi_reduction <add>, %60, %cst_25 [1] : vector<1x128xf32> to vector<1xf32>
    %62 = vector.shape_cast %61 : vector<1xf32> to vector<1x1xf32>
    %63 = math.log %62 : vector<1x1xf32>
    %64 = vector.broadcast %63 : vector<1x1xf32> to vector<1x128xf32>
    %65 = arith.subf %59, %64 : vector<1x128xf32>
    %c0_26 = arith.constant 0 : index
    %c0_27 = arith.constant 0 : index
    %c0_28 = arith.constant 0 : index
    %66 = vector.load %arg10[%c0_26, %c0_27, %c0_28] : memref<1x1x128xf32, #tpu.memory_space<vmem>>, vector<1x1x128xf32>
    %67 = vector.shape_cast %66 : vector<1x1x128xf32> to vector<1x128xf32>
    %68 = vector.shape_cast %65 : vector<1x128xf32> to vector<1x1x128xf32>
    tpu.vector_store %arg10[%c0_26, %c0_27, %c0_28], %68 {strides = array<i32>} : memref<1x1x128xf32, #tpu.memory_space<vmem>>, vector<1x1x128xf32>,
    return
  }
  func.func @transform_0(%arg0: i32) -> (i32, i32, i32) {
    %c0_i32 = arith.constant 0 : i32
    %c0_i32_0 = arith.constant 0 : i32
    %c0_i32_1 = arith.constant 0 : i32
    return %arg0, %c0_i32, %c0_i32_0 : i32, i32, i32
  }
  func.func @transform_1(%arg0: i32) -> (i32, i32) {
    %c0_i32 = arith.constant 0 : i32
    %c0_i32_0 = arith.constant 0 : i32
    %c0_i32_1 = arith.constant 0 : i32
    return %c0_i32, %c0_i32_0 : i32, i32
  }
  func.func @transform_2(%arg0: i32) -> (i32, i32) {
    %c0_i32 = arith.constant 0 : i32
    %c0_i32_0 = arith.constant 0 : i32
    %c0_i32_1 = arith.constant 0 : i32
    return %c0_i32, %c0_i32_0 : i32, i32
  }
  func.func @transform_3(%arg0: i32) -> (i32, i32) {
    %c0_i32 = arith.constant 0 : i32
    %c0_i32_0 = arith.constant 0 : i32
    %c0_i32_1 = arith.constant 0 : i32
    return %c0_i32, %c0_i32_0 : i32, i32
  }
  func.func @transform_4(%arg0: i32) -> (i32, i32) {
    %c0_i32 = arith.constant 0 : i32
    %c0_i32_0 = arith.constant 0 : i32
    %c0_i32_1 = arith.constant 0 : i32
    return %c0_i32, %c0_i32_0 : i32, i32
  }
  func.func @transform_5(%arg0: i32) -> (i32, i32) {
    %c0_i32 = arith.constant 0 : i32
    %c0_i32_0 = arith.constant 0 : i32
    %c0_i32_1 = arith.constant 0 : i32
    return %c0_i32, %c0_i32_0 : i32, i32
  }
  func.func @transform_6(%arg0: i32) -> (i32, i32) {
    %c0_i32 = arith.constant 0 : i32
    %c0_i32_0 = arith.constant 0 : i32
    %c0_i32_1 = arith.constant 0 : i32
    return %c0_i32, %c0_i32_0 : i32, i32
  }
  func.func @transform_7(%arg0: i32) -> (i32, i32) {
    %c0_i32 = arith.constant 0 : i32
    %c0_i32_0 = arith.constant 0 : i32
    %c0_i32_1 = arith.constant 0 : i32
    return %c0_i32, %c0_i32_0 : i32, i32
  }
  func.func @transform_8(%arg0: i32) -> (i32, i32) {
    %c0_i32 = arith.constant 0 : i32
    %c0_i32_0 = arith.constant 0 : i32
    %c0_i32_1 = arith.constant 0 : i32
    return %c0_i32, %c0_i32_0 : i32, i32
  }
  func.func @transform_9(%arg0: i32) -> (i32, i32, i32) {
    %c0_i32 = arith.constant 0 : i32
    %c0_i32_0 = arith.constant 0 : i32
    %c0_i32_1 = arith.constant 0 : i32
    return %arg0, %c0_i32, %c0_i32_0 : i32, i32, i32
  }
}

</mosaic_0001>

<bundles_post_ra>
// kernel: mnist_pallas.1
= control target key start
LH: loop header
LB: loop body
LE: loop exit
PB: predicated region body
PF: predicated region fallthrough
CT: control target
= control target key end

     0   :  { %14 = vsyncpa [#allocation3], 0  ;;  %s3596_s0 = inlined_call_operand.vmem [shape: f32[2,28,28], index: 0, kind: input, shape index: {}]   ;;  %s3597_s1 = inlined_call_operand.vmem [shape: bf16[84,208], index: 1, kind: input, shape index: {}]   ;;  %s3598_s2 = inlined_call_operand.vmem [shape: f32[1,208], index: 2, kind: input, shape index: {}]   ;;  %s3599_s3 = inlined_call_operand.vmem [shape: bf16[600,176], index: 3, kind: input, shape index: {}]   ;;  %s3600_s4 = inlined_call_operand.vmem [shape: f32[1,176], index: 4, kind: input, shape index: {}]   ;;  %s3601_s5 = inlined_call_operand.vmem [shape: bf16[800,32], index: 5, kind: input, shape index: {}]   ;;  %s3602_s6 = inlined_call_operand.vmem [shape: f32[1,32], index: 6, kind: input, shape index: {}]   ;;  %s3603_s7 = inlined_call_operand.vmem [shape: bf16[32,128], index: 7, kind: input, shape index: {}]   ;;  %s3604_s8 = inlined_call_operand.vmem [shape: f32[1,128], index: 8, kind: input, shape index: {}]   ;;  %s3605_s9 = inlined_call_operand.hbm [shape: f32[2,1,128], index: 9, kind: output, shape index: {}]  }
   0x1   :  { %16 = vsyncpa [#allocation3 + $0x1], 0  ;;  %s2881_s30 = smov 0   ;;  %s2883_s10 = smov 0  }
   0x2   :  { %s2885_s11 = smov 0   ;;  %s2887_s12 = smov 0  }
   0x3 LB: > { %s2902_s13 = sadd.s32 4294967295, %s2816_s12   ;;  %s2169_s14 = sadd.s32 4294967294, %s2816_s12   ;;  %s2816_s12 = sphi %s2887_s12, %s3611_s12   ;;  %s2812_s11 = sphi %s2885_s11, %s3610_s11   ;;  %s2808_s10 = sphi %s2883_s10, %s3609_s10   ;;  %s2804_s30 = sphi %s2881_s30, %s3608_s30  }
   0x4   : > { %s2906_s15 = sadd.s32 1, %s2816_s12   ;;  %s223_s16 = sadd.s32 1, %s2812_s11 }
   0x5   : > { %s220_s17 = ssub.s32 %s2816_s12, %s2906_s15  ;;  %p233_p0 = scmp.ne.s32.totalorder %s2812_s11, %s2808_s10 }
   0x6   : > { %p221_p1 = scmp.eq.s32.totalorder %s220_s17, 0  ;;  %p234_p2 = scmp.eq.s32.totalorder %s2902_s13, 1 }
   0x7   : > { %p239_p3 = scmp.ne.s32.totalorder %s2808_s10, %s2804_s30  ;;  %p240_p4 = scmp.eq.s32.totalorder %s2169_s14, 1 }
   0x8   : > { %s2917_s18 = scalar_select %p221_p1, %s2812_s11, %s223_s16  }
   0x9   : > { %p2919_p5 = por %p234_p2, %p233_p0  ;;  %p2923_p6 = por %p240_p4, %p239_p3 }
   0xa   : > { %p2172_p7 = scmp.ge.s32.totalorder %s2816_s12, 1  ;;  %p290_p8 = scmp.lt.s32.totalorder %s2816_s12, 3 }
   0xc   : > { %p291_p9 = pnand %p2172_p7, %p290_p8 }
   0xd   : > { %p325_p10 = scmp.lt.s32.totalorder (!%p291_p9), %s2902_s13, 1  ;;  %v2568_v0 = vld [vmem:[%s3597_s1 + $0x4] ss:$8 sps:$4 sm:$0xff] (!%p291_p9)   ;;  %v2570_v1 = vld [vmem:[%s3597_s1] ss:$8 sps:$4 sm:$0xff] (!%p291_p9)   ;;  %vm339_vm0 = vcmask (!%p291_p9), 1046528   ;;  %v404_v59 = vlaneseq (!%p291_p9) }
   0xe   : > { %294 = sbr.rel (%p291_p9) target bundleno = 2024 (0x7e8), region = 56  ;;  %v2571_v2 = vld [vmem:[%s3597_s1 + $0x14] ss:$8 sps:$4 sm:$0xff] (!%p291_p9)   ;;  %483 = vmatprep.subr.bf16.mxu0 (!%p291_p9), %v2568_v0  ;;  %v2573_v3 = vld [vmem:[%s3597_s1 + $0x10] ss:$8 sps:$4 sm:$0xff] (!%p291_p9)   ;;  %vm359_vm1 = vcmask (!%p291_p9), 1045504  }
   0xf   : > { %484 = vmatpush1.bf16.msra.mxu0 (!%p291_p9), %v2570_v1  ;;  %v2574_v4 = vld [vmem:[%s3597_s1 + $0x24] ss:$8 sps:$4 sm:$0xff] (!%p291_p9)   ;;  %v2576_v8 = vld [vmem:[%s3597_s1 + $0x20] ss:$8 sps:$4 sm:$0xff] (!%p291_p9)   ;;  %v2818_v14 = vmov (!%p291_p9), 0   ;;  %s2819_s17 = smov (!%p291_p9), 28  }
  0x10   : > { %485 = vmatprep.subr.bf16.mxu0 (!%p291_p9), %v2571_v2  ;;  %515 = vmatprep.mubr.bf16.mxu0 (!%p291_p9), %v2818_v14  ;;  %v2577_v21 = vld [vmem:[%s3597_s1 + $0x34] ss:$8 sps:$4 sm:$0xff] (!%p291_p9)   ;;  %v2579_v26 = vld [vmem:[%s3597_s1 + $0x30] ss:$8 sps:$4 sm:$0xff] (!%p291_p9)   ;;  %v2580_v29 = vld [vmem:[%s3597_s1 + $0x44] ss:$8 sps:$4 sm:$0xff] (!%p291_p9)  }
  0x11   : > { %v401_v31 = vld [vmem:[%s3597_s1 + $0x50] sm:$0x33] (!%p291_p9)  ;;  %s2820_s23 = smov (!%p291_p9), 56   ;;  %v2582_v33 = vld [vmem:[%s3597_s1 + $0x40] ss:$8 sps:$4 sm:$0xff] (!%p291_p9)   ;;  %vm476_vm2 = vcmask (!%p291_p9), 1041408  }
  0x12   : > { %v2186_v34 = vcombine.high (!%p291_p9), %v401_v31, %v401_v31  ;;  %v2185_v35 = vcombine.low (!%p291_p9), %v401_v31, %v401_v31  ;;  %vm379_vm3 = vcmask (!%p291_p9), 228352   ;;  %vm384_vm4 = vcmask (!%p291_p9), 457728   ;;  %v402_v62 = vld [vmem:[%s3598_s2] sm:$0x3] (!%p291_p9)  ;;  %s2823_s24 = smov (!%p291_p9), 16   ;;  %s2824_s27 = smov (!%p291_p9), 112  }
  0x13   : > { %486 = vmatpush1.bf16.msra.mxu0 (!%p291_p9), %v2573_v3  ;;  %vm469_vm5 = vcmask (!%p291_p9), 687104   ;;  %v2988_v60 = vshrl.u32 (!%p291_p9), %v404_v59, 7  ;;  %v2594_v59 = vld [vmem:[%s3599_s3 + $0x34] ss:$8 sps:$4 sm:$0xff] (!%p291_p9)   ;;  %vm606_vm6 = vcmask (!%p291_p9), 982016   ;;  %vm670_vm7 = vcmask (!%p291_p9), 1043456  }
  0x14   : > { %487 = vmatprep.subr.bf16.mxu0 (!%p291_p9), %v2574_v4  ;;  %v478_v36 = vsel (!%p291_p9), %vm476_vm2, %v2185_v35, 0  ;;  %vm655_vm8 = vcmask (!%p291_p9), 588800   ;;  %vm697_vm9 = vcmask (!%p291_p9), 130048   ;;  %vm1185_vm10 = vcmask (!%p291_p9), 719872   ;;  %s2825_s29 = smov (!%p291_p9), 32   ;;  %s2826_s14 = smov (!%p291_p9), 64  }
  0x15   : > { %s326_s25 = scalar_select %p325_p10, %s2902_s13, 1  ;;  %v406_v61 = vsub.s32 0, %v2988_v60  ;;  %v410_v63 = vsub.s32 1, %v2988_v60  ;;  %vm1403_vm11 = vcmask 916480   ;;  %vm1427_vm12 = vcmask 261120  }
  0x16   : > { %s2827_s16 = smov 96   ;;  %vm1437_vm13 = vcmask 523264   ;;  %vm1447_vm14 = vcmask 785408   ;;  %vm2829_vm15 = vmmov 0   ;;  %s323_s22 = sand.u32 1, %s2808_s10  }
  0x17   : > { %s2326_s28 = sshll.u32 %s326_s25, 5  ;;  %488 = vmatpush1.bf16.msra.mxu0 %v2576_v8  ;;  %v407_v0 = vrot.slane %v402_v62, %v406_v61  ;;  %v411_v1 = vrot.slane %v402_v62, %v410_v63  ;;  %v2596_v62 = vld [vmem:[%s3599_s3 + $0x30] ss:$8 sps:$4 sm:$0xff]  }
  0x18   : > { %s329_s21 = scalar_lea.vmem %s3596_s0, %s2326_s28  ;;  %489 = vmatprep.subr.bf16.mxu0 %v2577_v21  ;;  %s2821_s28 = smov 120  }
  0x19   : > { %v331_v5 = vld [vmem:[%s329_s21] sm:$0xff]  ;;  %v332_v6 = vld [vmem:[%s329_s21 + $0x8] sm:$0xff]  ;;  %v2949_v7 = vld [vmem:[%s329_s21 + $0x10] sm:$0xff] }
  0x1a   : > { %v340_v9 = vrot.slane %v331_v5, 1  ;;  %v341_v10 = vrot.slane %v332_v6, 1  ;;  %v343_v11 = vrot.slane %v2949_v7, 1  ;;  %v360_v12 = vrot.slane %v331_v5, 2  ;;  %v334_v13 = vld [vmem:[%s329_s21 + $0x18] sm:$0xf] }
  0x1b   : > { %v361_v15 = vrot.slane %v332_v6, 2  ;;  %v363_v16 = vrot.slane %v2949_v7, 2  ;;  %v345_v17 = vrot.slane %v334_v13, 1  ;;  %v365_v18 = vrot.slane %v334_v13, 2  ;;  %490 = vmatpush1.bf16.msra.mxu0 %v2579_v26 }
  0x1c   : > { %v342_v19 = vsel %vm339_vm0, %v340_v9, %v341_v10  ;;  %v344_v20 = vsel %vm339_vm0, %v341_v10, %v343_v11  ;;  %491 = vmatprep.subr.bf16.mxu0 %v2580_v29 }
  0x1d   : > { %v2488_v22 = vpack.i.bf16 %v344_v20, %v342_v19  ;;  %v362_v23 = vsel %vm359_vm1, %v360_v12, %v361_v15  ;;  %v364_v24 = vsel %vm359_vm1, %v361_v15, %v363_v16  ;;  %v346_v25 = vsel %vm339_vm0, %v343_v11, %v345_v17 }
  0x1e   : > { %v2498_v27 = vpack.i.bf16 %v345_v17, %v346_v25  ;;  %v366_v28 = vsel %vm359_vm1, %v363_v16, %v365_v18  ;;  %v2493_v30 = vpack.i.bf16 %v364_v24, %v362_v23 }
  0x1f   : > { %2489 = vrot.lane.b32.xlu0 %v2488_v22, %s2819_s17  ;;  %v2503_v32 = vpack.i.bf16 %v365_v18, %v366_v28  ;;  %492 = vmatpush1.bf16.msra.mxu0 %v2582_v33 }
  0x20   : > { %2499 = vrot.lane.b32.xlu1 %v2498_v27, %s2819_s17  ;;  %2187 = vmatprep.subr.msk.bf16.mxu0 %vm476_vm2, %v2186_v34 }
  0x23   : > { %2494 = vrot.lane.b32.xlu0 %v2493_v30, %s2820_s23  ;;  %494 = vmatpush1.bf16.msra.mxu0 %v478_v36 }
  0x24   : > { %2504 = vrot.lane.b32.xlu1 %v2503_v32, %s2820_s23  ;;  %s2822_s23 = smov 72  }
  0x91   : > { %v2490_v37 = vpop.permute.xlu0 %2489 }
  0x92   : > { %v2500_v38 = vpop.permute.xlu1 %2499  ;;  %v2492_v39 = vunpack.i.h.bf16 %v2490_v37  ;;  %v2491_v40 = vunpack.i.l.bf16 %v2490_v37 }
  0x93   : > { %v2502_v46 = vunpack.i.h.bf16 %v2500_v38  ;;  %v2501_v47 = vunpack.i.l.bf16 %v2500_v38 }
  0x94   : > { %v381_v44 = vsel %vm379_vm3, %v332_v6, %v2492_v39  ;;  %v380_v45 = vsel %vm379_vm3, %v331_v5, %v2491_v40 }
  0x95   : > { %v2495_v41 = vpop.permute.xlu0 %2494  ;;  %v383_v54 = vsel %vm379_vm3, %v334_v13, %v2502_v46  ;;  %v382_v55 = vsel %vm379_vm3, %v2949_v7, %v2501_v47 }
  0x96   : > { %v2497_v42 = vunpack.i.h.bf16 %v2495_v41  ;;  %v2496_v43 = vunpack.i.l.bf16 %v2495_v41  ;;  %v2505_v48 = vpop.permute.xlu1 %2504 }
  0x97   : > { %v2507_v52 = vunpack.i.h.bf16 %v2505_v48  ;;  %v2506_v53 = vunpack.i.l.bf16 %v2505_v48 }
  0x98   : > { %v385_v49 = vsel %vm384_vm4, %v380_v45, %v2496_v43  ;;  %v386_v50 = vsel %vm384_vm4, %v381_v44, %v2497_v42 }
  0x99   : > { %v389_v51 = vpack.c.bf16 %v386_v50, %v385_v49  ;;  %v387_v56 = vsel %vm384_vm4, %v382_v55, %v2506_v53  ;;  %v388_v57 = vsel %vm384_vm4, %v383_v54, %v2507_v52  ;;  %v2585_v53 = vld [vmem:[%s3599_s3 + $0x4] ss:$8 sps:$4 sm:$0xff]   ;;  %v2587_v54 = vld [vmem:[%s3599_s3] ss:$8 sps:$4 sm:$0xff]   ;;  %v2588_v55 = vld [vmem:[%s3599_s3 + $0x14] ss:$8 sps:$4 sm:$0xff]  }
  0x9a   : > { %v390_v58 = vpack.c.bf16 %v388_v57, %v387_v56  ;;  %1198 = vmatprep.subr.bf16.mxu1 %v2585_v53  ;;  %v2590_v56 = vld [vmem:[%s3599_s3 + $0x10] ss:$8 sps:$4 sm:$0xff]   ;;  %v2591_v57 = vld [vmem:[%s3599_s3 + $0x24] ss:$8 sps:$4 sm:$0xff]  }
  0x9b   : > { %2188 = vmatmul.mubr.msk.bf16.vlgmr.msra.gmra.mrb[0].mxu0 %vm469_vm5, %v389_v51  ;;  %1199 = vmatpush1.bf16.msra.mxu1 %v2587_v54 }
  0x9c   : > { %525 = vmatprep.mubr.bf16.mxu0 %v2818_v14  ;;  %1200 = vmatprep.subr.bf16.mxu1 %v2588_v55 }
  0x9f   : > { %1201 = vmatpush1.bf16.msra.mxu1 %v2590_v56 }
  0xa0   : > { %1202 = vmatprep.subr.bf16.mxu1 %v2591_v57 }
  0xa3   : > { %2189 = vmatmul.mubr.msk.bf16.gmra.mrb[4].mxu0 %vm469_vm5, %v390_v58  ;;  %v2593_v58 = vld [vmem:[%s3599_s3 + $0x20] ss:$8 sps:$4 sm:$0xff]  }
  0xa4   : > { %1203 = vmatpush1.bf16.msra.mxu1 %v2593_v58 }
  0xa5   : > { %1204 = vmatprep.subr.bf16.mxu1 %v2594_v59 }
  0xa8   : > { %1205 = vmatpush1.bf16.msra.mxu1 %v2596_v62 }
 0x16e   : > { %v517_v2 = vpop.f32.mrb[0].mxu0 }
 0x16f   : > { %v518_v3 = vadd.f32 %v517_v2, %v407_v0  ;;  %v519_v4 = vpop.f32.mrb[1].mxu0  ;;  %v2600_v2 = vld [vmem:[%s3599_s3 + $0x54] ss:$8 sps:$4 sm:$0xff]  }
 0x170   : > { %v520_v5 = vadd.f32 %v519_v4, %v411_v1  ;;  %v521_v6 = vpop.f32.mrb[2].mxu0  ;;  %v2603_v4 = vld [vmem:[%s3599_s3 + $0x64] ss:$8 sps:$4 sm:$0xff]  }
 0x171   : > { %v536_v7 = vmax.f32 %v518_v3, 0.0  ;;  %v522_v8 = vadd.f32 %v521_v6, %v407_v0  ;;  %v523_v9 = vpop.f32.mrb[3].mxu0  ;;  %v2602_v3 = vld [vmem:[%s3599_s3 + $0x50] ss:$8 sps:$4 sm:$0xff]   ;;  %v2606_v6 = vld [vmem:[%s3599_s3 + $0x74] ss:$8 sps:$4 sm:$0xff]  }
 0x172   : > { %v537_v10 = vmax.f32 %v520_v5, 0.0  ;;  %v524_v11 = vadd.f32 %v523_v9, %v411_v1  ;;  %v2605_v5 = vld [vmem:[%s3599_s3 + $0x60] ss:$8 sps:$4 sm:$0xff]  }
 0x173   : > { %v538_v12 = vmax.f32 %v522_v8, 0.0  ;;  %v552_v15 = vrot.slane %v536_v7, 1  ;;  %v2609_v8 = vld [vmem:[%s3599_s3 + $0x84] ss:$8 sps:$4 sm:$0xff]   ;;  %v2611_v9 = vld [vmem:[%s3599_s3 + $0x80] ss:$8 sps:$4 sm:$0xff]  }
 0x174   : > { %v539_v13 = vmax.f32 %v524_v11, 0.0  ;;  %v555_v17 = vrot.slane %v537_v10, 1  ;;  %v2614_v11 = vld [vmem:[%s3599_s3 + $0x90] ss:$8 sps:$4 sm:$0xff]  }
 0x175   : > { %v553_v16 = vrot.slane %v538_v12, 1 }
 0x176   : > { %v556_v18 = vrot.slane %v539_v13, 1  ;;  %v527_v19 = vpop.f32.mrb[4].mxu0 }
 0x177   : > { %v528_v20 = vadd.f32 %v527_v19, %v407_v0  ;;  %v529_v21 = vpop.f32.mrb[5].mxu0  ;;  %v554_v22 = vsel %vm339_vm0, %v552_v15, %v553_v16  ;;  %v2618_v15 = vld [vmem:[%s3599_s3 + $0xb4] ss:$8 sps:$4 sm:$0xff]  }
 0x178   : > { %v530_v23 = vadd.f32 %v529_v21, %v411_v1  ;;  %v531_v24 = vpop.f32.mrb[6].mxu0  ;;  %v557_v25 = vsel %vm339_vm0, %v555_v17, %v556_v18  ;;  %v3001_v26 = vmax.f32 %v536_v7, %v554_v22  ;;  %v2608_v7 = vld [vmem:[%s3599_s3 + $0x70] ss:$8 sps:$4 sm:$0xff]   ;;  %v2621_v17 = vld [vmem:[%s3599_s3 + $0xc4] ss:$8 sps:$4 sm:$0xff]  }
 0x179   : > { %v540_v27 = vmax.f32 %v528_v20, 0.0  ;;  %v532_v28 = vadd.f32 %v531_v24, %v407_v0  ;;  %v533_v29 = vpop.f32.mrb[7].mxu0  ;;  %v3003_v30 = vmax.f32 %v537_v10, %v557_v25  ;;  %v2597_v0 = vld [vmem:[%s3599_s3 + $0x44] ss:$8 sps:$4 sm:$0xff]   ;;  %v2612_v10 = vld [vmem:[%s3599_s3 + $0x94] ss:$8 sps:$4 sm:$0xff]  }
 0x17a   : > { %v541_v31 = vmax.f32 %v530_v23, 0.0  ;;  %v534_v32 = vadd.f32 %v533_v29, %v411_v1  ;;  %v2599_v1 = vld [vmem:[%s3599_s3 + $0x40] ss:$8 sps:$4 sm:$0xff]   ;;  %1206 = vmatprep.subr.bf16.mxu1 %v2597_v0  ;;  %v2624_v19 = vld [vmem:[%s3599_s3 + $0xd4] ss:$8 sps:$4 sm:$0xff]  }
 0x17b   : > { %v558_v33 = vrot.slane %v540_v27, 1  ;;  %v542_v34 = vmax.f32 %v532_v28, 0.0  ;;  %v2508_v35 = vpack.i.bf16 %v3003_v30, %v3001_v26  ;;  %1207 = vmatpush1.bf16.msra.mxu1 %v2599_v1  ;;  %v2626_v20 = vld [vmem:[%s3599_s3 + $0xd0] ss:$8 sps:$4 sm:$0xff]   ;;  %v2627_v21 = vld [vmem:[%s3599_s3 + $0xe4] ss:$8 sps:$4 sm:$0xff]  }
 0x17c   : > { %v560_v36 = vrot.slane %v541_v31, 1  ;;  %v543_v37 = vmax.f32 %v534_v32, 0.0  ;;  %1208 = vmatprep.subr.bf16.mxu1 %v2600_v2  ;;  %v2629_v22 = vld [vmem:[%s3599_s3 + $0xe0] ss:$8 sps:$4 sm:$0xff]  }
 0x17d   : > { %v562_v38 = vrot.slane %v542_v34, 1  ;;  %2509 = vrot.lane.b32.xlu0 %v2508_v35, %s2821_s28  ;;  %v559_v39 = vsel %vm339_vm0, %v553_v16, %v558_v33  ;;  %v2620_v16 = vld [vmem:[%s3599_s3 + $0xb0] ss:$8 sps:$4 sm:$0xff]  }
 0x17e   : > { %v564_v40 = vrot.slane %v543_v37, 1  ;;  %v561_v41 = vsel %vm339_vm0, %v556_v18, %v560_v36  ;;  %v3009_v42 = vmax.f32 %v538_v12, %v559_v39  ;;  %v2615_v12 = vld [vmem:[%s3599_s3 + $0xa4] ss:$8 sps:$4 sm:$0xff]   ;;  %v2623_v18 = vld [vmem:[%s3599_s3 + $0xc0] ss:$8 sps:$4 sm:$0xff]  }
 0x17f   : > { %v3011_v43 = vmax.f32 %v539_v13, %v561_v41  ;;  %v563_v44 = vsel %vm339_vm0, %v558_v33, %v562_v38  ;;  %v3021_v49 = vmax.f32 %v542_v34, %v562_v38  ;;  %1209 = vmatpush1.bf16.msra.mxu1 %v2602_v3  ;;  %v2617_v13 = vld [vmem:[%s3599_s3 + $0xa0] ss:$8 sps:$4 sm:$0xff]   ;;  %v2630_v34 = vld [vmem:[%s3599_s3 + $0xf4] ss:$8 sps:$4 sm:$0xff]   ;;  %v2632_v39 = vld [vmem:[%s3599_s3 + $0xf0] ss:$8 sps:$4 sm:$0xff]  }
 0x180   : > { %v565_v45 = vsel %vm339_vm0, %v560_v36, %v564_v40  ;;  %v3015_v46 = vmax.f32 %v540_v27, %v563_v44  ;;  %v3023_v50 = vmax.f32 %v543_v37, %v564_v40  ;;  %1210 = vmatprep.subr.bf16.mxu1 %v2603_v4  ;;  %vm2087_vm0 = vcmask 1040384  }
 0x181   : > { %v2513_v47 = vpack.i.bf16 %v3011_v43, %v3009_v42  ;;  %v3019_v48 = vmax.f32 %v541_v31, %v565_v45  ;;  %v2635_v45 = vld [vmem:[%s3599_s3 + $0x104] ss:$8 sps:$4 sm:$0xff]  }
 0x182   : > { %v2528_v52 = vpack.i.bf16 %v3023_v50, %v3021_v49 }
 0x183   : > { %2514 = vrot.lane.b32.xlu1 %v2513_v47, %s2821_s28  ;;  %v2518_v51 = vpack.i.bf16 %v3019_v48, %v3015_v46  ;;  %1211 = vmatpush1.bf16.msra.mxu1 %v2605_v5 }
 0x184   : > { %1212 = vmatprep.subr.bf16.mxu1 %v2606_v6 }
 0x185   : > { %2519 = vrot.lane.b32.xlu0 %v2518_v51, %s2821_s28 }
 0x187   : > { %1213 = vmatpush1.bf16.msra.mxu1 %v2608_v7 }
 0x188   : > { %1214 = vmatprep.subr.bf16.mxu1 %v2609_v8 }
 0x189   : > { %2529 = vrot.lane.b32.xlu0 %v2528_v52, %s2821_s28 }
 0x18b   : > { %1215 = vmatpush1.bf16.msra.mxu1 %v2611_v9 }
 0x18c   : > { %1216 = vmatprep.subr.bf16.mxu1 %v2612_v10 }
 0x18f   : > { %1217 = vmatpush1.bf16.msra.mxu1 %v2614_v11 }
 0x190   : > { %1218 = vmatprep.subr.bf16.mxu1 %v2615_v12 }
 0x193   : > { %1219 = vmatpush1.bf16.msra.mxu1 %v2617_v13 }
 0x194   : > { %1220 = vmatprep.subr.bf16.mxu1 %v2618_v15 }
 0x197   : > { %1221 = vmatpush1.bf16.msra.mxu1 %v2620_v16 }
 0x198   : > { %1222 = vmatprep.subr.bf16.mxu1 %v2621_v17 }
 0x19b   : > { %1223 = vmatpush1.bf16.msra.mxu1 %v2623_v18 }
 0x19c   : > { %1224 = vmatprep.subr.bf16.mxu1 %v2624_v19 }
 0x19f   : > { %1225 = vmatpush1.bf16.msra.mxu1 %v2626_v20 }
 0x1a0   : > { %1226 = vmatprep.subr.bf16.mxu1 %v2627_v21 }
 0x1a3   : > { %1227 = vmatpush1.bf16.msra.mxu1 %v2629_v22 }
 0x1a4   : > { %1228 = vmatprep.subr.bf16.mxu1 %v2630_v34 }
 0x1a7   : > { %1229 = vmatpush1.bf16.msra.mxu1 %v2632_v39 }
 0x1a8   : > { %1249 = vmatprep.subr.bf16.mxu1 %v2635_v45 }
 0x1ef   : > { %v2510_v23 = vpop.permute.xlu0 %2509 }
 0x1f0   : > { %v2512_v24 = vunpack.i.h.bf16 %v2510_v23  ;;  %v2511_v25 = vunpack.i.l.bf16 %v2510_v23 }
 0x1f2   : > { %v607_v28 = vsel %vm606_vm6, %v2511_v25, %v2512_v24  ;;  %v3121_v32 = vmax.f32 %v3003_v30, %v2512_v24 }
 0x1f3   : > { %v3134_v40 = vmax.f32 %v3001_v26, %v607_v28 }
 0x1f4   : > { %v636_v52 = vrot.slane %v3121_v32, 2  ;;  %v674_v6 = vrot.slane %v3121_v32, 4 }
 0x1f5   : > { %v2515_v27 = vpop.permute.xlu1 %2514  ;;  %v633_v53 = vrot.slane %v3134_v40, 2  ;;  %v671_v8 = vrot.slane %v3134_v40, 4 }
 0x1f6   : > { %v2517_v29 = vunpack.i.h.bf16 %v2515_v27  ;;  %v2516_v31 = vunpack.i.l.bf16 %v2515_v27 }
 0x1f7   : > { %v2520_v33 = vpop.permute.xlu0 %2519 }
 0x1f8   : > { %v3127_v35 = vmax.f32 %v3011_v43, %v2517_v29  ;;  %v608_v36 = vsel %vm606_vm6, %v2516_v31, %v2517_v29  ;;  %v2522_v37 = vunpack.i.h.bf16 %v2520_v33  ;;  %v2521_v38 = vunpack.i.l.bf16 %v2520_v33 }
 0x1f9   : > { %v3137_v30 = vmax.f32 %v3009_v42, %v608_v36 }
 0x1fa   : > { %v637_v41 = vrot.slane %v3127_v35, 2  ;;  %v3141_v43 = vmax.f32 %v3019_v48, %v2522_v37  ;;  %v609_v44 = vsel %vm606_vm6, %v2521_v38, %v2522_v37  ;;  %v675_v3 = vrot.slane %v3127_v35, 4  ;;  %v2633_v37 = vld [vmem:[%s3599_s3 + $0x100] ss:$8 sps:$4 sm:$0xff]  }
 0x1fb   : > { %v3148_v47 = vmax.f32 %v3015_v46, %v609_v44  ;;  %v2530_v26 = vpop.permute.xlu0 %2529  ;;  %v634_v42 = vrot.slane %v3137_v30, 2  ;;  %v713_v51 = vpack.c.bf16 %v3137_v30, %v3134_v40  ;;  %v672_v5 = vrot.slane %v3137_v30, 4 }
 0x1fc   : > { %v641_v48 = vrot.slane %v3141_v43, 2  ;;  %v2532_v55 = vunpack.i.h.bf16 %v2530_v26  ;;  %v2531_v56 = vunpack.i.l.bf16 %v2530_v26  ;;  %v638_v46 = vsel %vm359_vm1, %v636_v52, %v637_v41 }
 0x1fd   : > { %v639_v54 = vrot.slane %v3148_v47, 2  ;;  %v635_v59 = vsel %vm359_vm1, %v633_v53, %v634_v42  ;;  %v679_v0 = vrot.slane %v3141_v43, 4  ;;  %v677_v2 = vrot.slane %v3148_v47, 4 }
 0x1fe   : > { %v642_v57 = vsel %vm359_vm1, %v637_v41, %v641_v48  ;;  %v610_v4 = vsel %vm606_vm6, %v2531_v56, %v2532_v55  ;;  %v676_v11 = vsel %vm670_vm7, %v674_v6, %v675_v3  ;;  %v673_v13 = vsel %vm670_vm7, %v671_v8, %v672_v5  ;;  %v2657_v6 = vld [vmem:[%s3599_s3 + $0x180] ss:$8 sps:$4 sm:$0xff]   ;;  %v2660_v8 = vld [vmem:[%s3599_s3 + $0x190] ss:$8 sps:$4 sm:$0xff]  }
 0x1ff   : > { %v2533_v58 = vpack.i.bf16 %v642_v57, %v638_v46  ;;  %v640_v62 = vsel %vm359_vm1, %v634_v42, %v639_v54  ;;  %v680_v7 = vsel %vm670_vm7, %v675_v3, %v679_v0  ;;  %v678_v9 = vsel %vm670_vm7, %v672_v5, %v677_v2  ;;  %v2644_v46 = vld [vmem:[%s3599_s3 + $0x134] ss:$8 sps:$4 sm:$0xff]   ;;  %v2659_v5 = vld [vmem:[%s3599_s3 + $0x184] ss:$8 sps:$4 sm:$0xff]  }
 0x200   : > { %v2523_v1 = vpack.i.bf16 %v640_v62, %v635_v59  ;;  %v625_v10 = vmax.f32 %v3021_v49, %v610_v4  ;;  %v2543_v12 = vpack.i.bf16 %v680_v7, %v676_v11  ;;  %v2538_v15 = vpack.i.bf16 %v678_v9, %v673_v13  ;;  %v2647_v59 = vld [vmem:[%s3599_s3 + $0x144] ss:$8 sps:$4 sm:$0xff]   ;;  %v2650_v62 = vld [vmem:[%s3599_s3 + $0x154] ss:$8 sps:$4 sm:$0xff]   ;;  %v2654_v4 = vld [vmem:[%s3599_s3 + $0x170] ss:$8 sps:$4 sm:$0xff]  }
 0x201   : > { %2534 = vrot.lane.b32.xlu0 %v2533_v58, %s2822_s23  ;;  %v626_v16 = vmax.f32 %v3023_v50, %v2532_v55  ;;  %v2639_v55 = vld [vmem:[%s3599_s3 + $0x120] ss:$8 sps:$4 sm:$0xff]   ;;  %v718_v56 = vpack.c.bf16 %v3148_v47, %v3148_v47  ;;  %v2642_v58 = vld [vmem:[%s3599_s3 + $0x130] ss:$8 sps:$4 sm:$0xff]   ;;  %v2656_v3 = vld [vmem:[%s3599_s3 + $0x174] ss:$8 sps:$4 sm:$0xff]  }
 0x202   : > { %2524 = vrot.lane.b32.xlu1 %v2523_v1, %s2822_s23  ;;  %v681_v17 = vrot.slane %v625_v10, 4  ;;  %v2645_v47 = vld [vmem:[%s3599_s3 + $0x140] ss:$8 sps:$4 sm:$0xff]   ;;  %v2653_v1 = vld [vmem:[%s3599_s3 + $0x164] ss:$8 sps:$4 sm:$0xff]  }
 0x203   : > { %v683_v18 = vrot.slane %v626_v16, 4  ;;  %v2662_v7 = vld [vmem:[%s3599_s3 + $0x194] ss:$8 sps:$4 sm:$0xff]   ;;  %v2665_v9 = vld [vmem:[%s3599_s3 + $0x1a4] ss:$8 sps:$4 sm:$0xff]  }
 0x204   : > { %v682_v19 = vsel %vm670_vm7, %v677_v2, %v681_v17  ;;  %v2651_v2 = vld [vmem:[%s3599_s3 + $0x160] ss:$8 sps:$4 sm:$0xff]   ;;  %v2668_v11 = vld [vmem:[%s3599_s3 + $0x1b4] ss:$8 sps:$4 sm:$0xff]   ;;  %v2671_v13 = vld [vmem:[%s3599_s3 + $0x1c4] ss:$8 sps:$4 sm:$0xff]  }
 0x205   : > { %653 = vrot.lane.b32.xlu0 %v641_v48, %s2822_s23  ;;  %v684_v20 = vsel %vm670_vm7, %v679_v0, %v683_v18  ;;  %v2641_v48 = vld [vmem:[%s3599_s3 + $0x124] ss:$8 sps:$4 sm:$0xff]   ;;  %v2648_v0 = vld [vmem:[%s3599_s3 + $0x150] ss:$8 sps:$4 sm:$0xff]   ;;  %v2663_v10 = vld [vmem:[%s3599_s3 + $0x1a0] ss:$8 sps:$4 sm:$0xff]  }
 0x206   : > { %651 = vrot.lane.b32.xlu1 %v639_v54, %s2822_s23  ;;  %v2674_v16 = vld [vmem:[%s3599_s3 + $0x1d4] ss:$8 sps:$4 sm:$0xff]   ;;  %v2672_v17 = vld [vmem:[%s3599_s3 + $0x1d0] ss:$8 sps:$4 sm:$0xff]   ;;  %v2677_v18 = vld [vmem:[%s3599_s3 + $0x1e4] ss:$8 sps:$4 sm:$0xff]  }
 0x207   : > { %s2323_s23 = sshll.u32 %s2902_s13, 4  ;;  %s2830_s13 = smov [#allocation2]  }
 0x208   : > { %s3554_s28 = scalar_lea.hbm %s3605_s9, %s2323_s23 }
 0x209   : > { %2544 = vrot.lane.b32.xlu0 %v2543_v12, %s2823_s24  ;;  %v2666_v12 = vld [vmem:[%s3599_s3 + $0x1b0] ss:$8 sps:$4 sm:$0xff]  }
 0x20a   : > { %2539 = vrot.lane.b32.xlu1 %v2538_v15, %s2823_s24  ;;  %v2669_v15 = vld [vmem:[%s3599_s3 + $0x1c0] ss:$8 sps:$4 sm:$0xff]  }
 0x20e   : > { %693 = vrot.lane.b32.xlu1 %v682_v19, %s2823_s24  ;;  %v2675_v19 = vld [vmem:[%s3599_s3 + $0x1e0] ss:$8 sps:$4 sm:$0xff]  }
 0x212   : > { %695 = vrot.lane.b32.xlu1 %v684_v20, %s2823_s24  ;;  %v2680_v20 = vld [vmem:[%s3599_s3 + $0x1f4] ss:$8 sps:$4 sm:$0xff]  }
 0x273   : > { %v2535_v49 = vpop.permute.xlu0 %2534 }
 0x274   : > { %v2537_v21 = vunpack.i.h.bf16 %v2535_v49  ;;  %v2536_v22 = vunpack.i.l.bf16 %v2535_v49  ;;  %v2525_v23 = vpop.permute.xlu1 %2524 }
 0x275   : > { %v2527_v24 = vunpack.i.h.bf16 %v2525_v23  ;;  %v2526_v25 = vunpack.i.l.bf16 %v2525_v23 }
 0x277   : > { %v3176_v27 = vsel %vm655_vm8, %v2527_v24, %v2537_v21  ;;  %v3178_v50 = vsel %vm655_vm8, %v2526_v25, %v2536_v22  ;;  %v3180_v28 = vpop.permute.xlu0 %653  ;;  %v707_v29 = vsel %vm655_vm8, %v3121_v32, %v2526_v25  ;;  %v708_v31 = vsel %vm655_vm8, %v3127_v35, %v2527_v24  ;;  %v2638_v32 = vld [vmem:[%s3599_s3 + $0x114] ss:$8 sps:$4 sm:$0xff]   ;;  %v2681_v24 = vld [vmem:[%s3599_s3 + $0x200] ss:$8 sps:$4 sm:$0xff]  }
 0x278   : > { %v715_v33 = vpack.c.bf16 %v3176_v27, %v3178_v50  ;;  %v652_v34 = vpop.permute.xlu1 %651  ;;  %v714_v36 = vpack.c.bf16 %v708_v31, %v707_v29  ;;  %v2686_v25 = vld [vmem:[%s3599_s3 + $0x214] ss:$8 sps:$4 sm:$0xff]   ;;  %v2689_v31 = vld [vmem:[%s3599_s3 + $0x224] ss:$8 sps:$4 sm:$0xff]  }
 0x279   : > { %v3190_v38 = vsel %vm655_vm8, %v652_v34, %v3180_v28  ;;  %v709_v39 = vsel %vm655_vm8, %v3141_v43, %v652_v34  ;;  %v2636_v43 = vld [vmem:[%s3599_s3 + $0x110] ss:$8 sps:$4 sm:$0xff]   ;;  %v2687_v34 = vld [vmem:[%s3599_s3 + $0x220] ss:$8 sps:$4 sm:$0xff]   ;;  %v2692_v50 = vld [vmem:[%s3599_s3 + $0x234] ss:$8 sps:$4 sm:$0xff]  }
 0x27a   : > { %v719_v41 = vpack.c.bf16 %v709_v39, %v709_v39  ;;  %1230 = vmatprep.mubr.bf16.mxu1 %v714_v36  ;;  %v720_v27 = vpack.c.bf16 %v3190_v38, %v3190_v38  ;;  %v2695_v36 = vld [vmem:[%s3599_s3 + $0x244] ss:$8 sps:$4 sm:$0xff]   ;;  %v2693_v38 = vld [vmem:[%s3599_s3 + $0x240] ss:$8 sps:$4 sm:$0xff]  }
 0x27b   : > { %v2545_v35 = vpop.permute.xlu0 %2544  ;;  %1231 = vmatmul.mubr.bf16.vlgmr.msra.gmra.mrb[0].mxu1 %v713_v51 }
 0x27c   : > { %v2547_v44 = vunpack.i.h.bf16 %v2545_v35  ;;  %v2546_v45 = vunpack.i.l.bf16 %v2545_v35  ;;  %1250 = vmatpush1.bf16.msra.mxu1 %v2633_v37  ;;  %v2540_v26 = vpop.permute.xlu1 %2539  ;;  %1240 = vmatprep.mubr.bf16.mxu1 %v719_v41  ;;  %v797_v37 = vld [vmem:[%s3599_s3 + $0x250] sm:$0xff] }
 0x27d   : > { %v2542_v42 = vunpack.i.h.bf16 %v2540_v26  ;;  %v2541_v52 = vunpack.i.l.bf16 %v2540_v26  ;;  %1251 = vmatprep.subr.bf16.mxu1 %v2638_v32  ;;  %v2265_v39 = vcombine.high %v797_v37, %v797_v37  ;;  %v2264_v32 = vcombine.low %v797_v37, %v797_v37  ;;  %v798_v26 = vld [vmem:[%s3600_s4] sm:$0x3]  ;;  %v2713_v37 = vld [vmem:[%s3601_s5 + $0x38] sm:$0xff]  }
 0x27f   : > { %v3206_v40 = vsel %vm697_vm9, %v2542_v42, %v2547_v44  ;;  %v3209_v30 = vsel %vm697_vm9, %v2541_v52, %v2546_v45  ;;  %v710_v51 = vsel %vm697_vm9, %v2536_v22, %v2541_v52  ;;  %v711_v53 = vsel %vm697_vm9, %v2537_v21, %v2542_v42  ;;  %v2678_v21 = vld [vmem:[%s3599_s3 + $0x1f0] ss:$8 sps:$4 sm:$0xff]   ;;  %v2683_v22 = vld [vmem:[%s3599_s3 + $0x204] ss:$8 sps:$4 sm:$0xff]  }
 0x280   : > { %v717_v54 = vpack.c.bf16 %v3206_v40, %v3209_v30  ;;  %1252 = vmatpush1.bf16.msra.mxu1 %v2636_v43  ;;  %v716_v57 = vpack.c.bf16 %v711_v53, %v710_v51  ;;  %v694_v49 = vpop.permute.xlu1 %693  ;;  %v1193_v41 = vsel %vm670_vm7, %v2264_v32, 0  ;;  %v803_v43 = vrot.slane %v798_v26, %v406_v61 }
 0x281   : > { %1253 = vmatprep.subr.bf16.mxu1 %v2641_v48  ;;  %v712_v23 = vsel %vm697_vm9, %v3180_v28, %v694_v49  ;;  %v2684_v28 = vld [vmem:[%s3599_s3 + $0x210] ss:$8 sps:$4 sm:$0xff]   ;;  %v807_v42 = vrot.slane %v798_v26, %v410_v63 }
 0x282   : > { %v721_v29 = vpack.c.bf16 %v712_v23, %v712_v23  ;;  %v2702_v23 = vld [vmem:[%s3601_s5 + $0x50] sm:$0xff]  }
 0x283   : > { %1241 = vmatmul.mubr.bf16.gmra.mrb[4].mxu1 %v718_v56 }
 0x284   : > { %1254 = vmatpush1.bf16.msra.mxu1 %v2639_v55  ;;  %1281 = vmatprep.mubr.bf16.mxu1 %v716_v57  ;;  %v696_v35 = vpop.permute.xlu1 %695 }
 0x285   : > { %1255 = vmatprep.subr.bf16.mxu1 %v2644_v46  ;;  %v700_v44 = vsel %vm697_vm9, %v694_v49, %v696_v35  ;;  %v2699_v49 = vld [vmem:[%s3601_s5] sm:$0xff]  }
 0x286   : > { %v722_v45 = vpack.c.bf16 %v700_v44, %v700_v44 }
 0x288   : > { %1256 = vmatpush1.bf16.msra.mxu1 %v2642_v58 }
 0x289   : > { %1257 = vmatprep.subr.bf16.mxu1 %v2647_v59 }
 0x28c   : > { %1258 = vmatpush1.bf16.msra.mxu1 %v2645_v47 }
 0x28d   : > { %1259 = vmatprep.subr.bf16.mxu1 %v2650_v62 }
 0x290   : > { %1260 = vmatpush1.bf16.msra.mxu1 %v2648_v0 }
 0x291   : > { %1261 = vmatprep.subr.bf16.mxu1 %v2653_v1 }
 0x294   : > { %1262 = vmatpush1.bf16.msra.mxu1 %v2651_v2 }
 0x295   : > { %1263 = vmatprep.subr.bf16.mxu1 %v2656_v3 }
 0x298   : > { %1264 = vmatpush1.bf16.msra.mxu1 %v2654_v4 }
 0x299   : > { %1265 = vmatprep.subr.bf16.mxu1 %v2659_v5 }
 0x29c   : > { %1266 = vmatpush1.bf16.msra.mxu1 %v2657_v6 }
 0x29d   : > { %1267 = vmatprep.subr.bf16.mxu1 %v2662_v7 }
 0x2a0   : > { %1268 = vmatpush1.bf16.msra.mxu1 %v2660_v8 }
 0x2a1   : > { %1269 = vmatprep.subr.bf16.mxu1 %v2665_v9 }
 0x2a4   : > { %1270 = vmatpush1.bf16.msra.mxu1 %v2663_v10 }
 0x2a5   : > { %1271 = vmatprep.subr.bf16.mxu1 %v2668_v11 }
 0x2a8   : > { %1272 = vmatpush1.bf16.msra.mxu1 %v2666_v12 }
 0x2a9   : > { %1273 = vmatprep.subr.bf16.mxu1 %v2671_v13 }
 0x2ac   : > { %1274 = vmatpush1.bf16.msra.mxu1 %v2669_v15 }
 0x2ad   : > { %1275 = vmatprep.subr.bf16.mxu1 %v2674_v16 }
 0x2b0   : > { %1276 = vmatpush1.bf16.msra.mxu1 %v2672_v17 }
 0x2b1   : > { %1277 = vmatprep.subr.bf16.mxu1 %v2677_v18 }
 0x2b4   : > { %1278 = vmatpush1.bf16.msra.mxu1 %v2675_v19 }
 0x2b5   : > { %1279 = vmatprep.subr.bf16.mxu1 %v2680_v20  ;;  %v2698_v20 = vld [vmem:[%s3601_s5 + $0x40] sm:$0xff]  }
 0x2b6   : > { %2327 = vmatprep.subr.bf16.mxu0 %v2698_v20  ;;  %v2727_v20 = vld [vmem:[%s3601_s5 + $0xb0] sm:$0xff]  }
 0x2b7   : > { %2328 = vmatpush3.bf16.msra.mxu0 %v2699_v49  ;;  %v2728_v49 = vld [vmem:[%s3601_s5 + $0xf8] sm:$0xff]  }
 0x2b8   : > { %1280 = vmatpush1.bf16.msra.mxu1 %v2678_v21  ;;  %v2700_v21 = vld [vmem:[%s3601_s5 + $0x48] sm:$0xff]  }
 0x2b9   : > { %1300 = vmatprep.subr.bf16.mxu1 %v2683_v22  ;;  %v2701_v22 = vld [vmem:[%s3601_s5 + $0x8] sm:$0xff]   ;;  %2329 = vmatprep.subr.bf16.mxu0 %v2700_v21 }
 0x2bb   : > { %1282 = vmatmul.mubr.bf16.vlgmr.msra.gmra.mrb[0].mxu1 %v715_v33  ;;  %v2690_v33 = vld [vmem:[%s3599_s3 + $0x230] ss:$8 sps:$4 sm:$0xff]   ;;  %2330 = vmatpush3.bf16.msra.mxu0 %v2701_v22 }
 0x2bc   : > { %1291 = vmatprep.mubr.bf16.mxu1 %v721_v29  ;;  %1301 = vmatpush1.bf16.msra.mxu1 %v2681_v24  ;;  %v2703_v24 = vld [vmem:[%s3601_s5 + $0x10] sm:$0xff]   ;;  %v2705_v29 = vld [vmem:[%s3601_s5 + $0x18] sm:$0xff]  }
 0x2bd   : > { %1302 = vmatprep.subr.bf16.mxu1 %v2686_v25  ;;  %2331 = vmatprep.subr.bf16.mxu0 %v2702_v23  ;;  %v2704_v25 = vld [vmem:[%s3601_s5 + $0x58] sm:$0xff]  }
 0x2be   : > { %v2729_v22 = vld [vmem:[%s3601_s5 + $0xb8] sm:$0xff]  }
 0x2bf   : > { %2332 = vmatpush3.bf16.msra.mxu0 %v2703_v24  ;;  %v2730_v24 = vld [vmem:[%s3601_s5 + $0x140] sm:$0xff]  }
 0x2c0   : > { %1303 = vmatpush1.bf16.msra.mxu1 %v2684_v28  ;;  %2333 = vmatprep.subr.bf16.mxu0 %v2704_v25  ;;  %v2706_v28 = vld [vmem:[%s3601_s5 + $0x60] sm:$0xff]  }
 0x2c1   : > { %1304 = vmatprep.subr.bf16.mxu1 %v2689_v31  ;;  %v2707_v31 = vld [vmem:[%s3601_s5 + $0x20] sm:$0xff]  }
 0x2c3   : > { %1292 = vmatmul.mubr.bf16.gmra.mrb[4].mxu1 %v720_v27  ;;  %2334 = vmatpush3.bf16.msra.mxu0 %v2705_v29  ;;  %v2709_v27 = vld [vmem:[%s3601_s5 + $0x28] sm:$0xff]  }
 0x2c4   : > { %1305 = vmatpush1.bf16.msra.mxu1 %v2687_v34  ;;  %1332 = vmatprep.mubr.bf16.mxu1 %v2818_v14  ;;  %v2708_v34 = vld [vmem:[%s3601_s5 + $0x68] sm:$0xff]  }
 0x2c5   : > { %1306 = vmatprep.subr.bf16.mxu1 %v2692_v50  ;;  %2335 = vmatprep.subr.bf16.mxu0 %v2706_v28  ;;  %v2710_v50 = vld [vmem:[%s3601_s5 + $0x70] sm:$0xff]   ;;  %v2731_v28 = vld [vmem:[%s3601_s5 + $0x100] sm:$0xff]  }
 0x2c7   : > { %2336 = vmatpush3.bf16.msra.mxu0 %v2707_v31 }
 0x2c8   : > { %1307 = vmatpush1.bf16.msra.mxu1 %v2690_v33  ;;  %2337 = vmatprep.subr.bf16.mxu0 %v2708_v34  ;;  %v2711_v33 = vld [vmem:[%s3601_s5 + $0x30] sm:$0xff]   ;;  %v2732_v34 = vld [vmem:[%s3601_s5 + $0x148] sm:$0xff]  }
 0x2c9   : > { %1308 = vmatprep.subr.bf16.mxu1 %v2695_v36  ;;  %v2712_v36 = vld [vmem:[%s3601_s5 + $0x78] sm:$0xff]  }
 0x2cb   : > { %2338 = vmatpush3.bf16.msra.mxu0 %v2709_v27 }
 0x2cc   : > { %1309 = vmatpush1.bf16.msra.mxu1 %v2693_v38  ;;  %2339 = vmatprep.subr.bf16.mxu0 %v2710_v50  ;;  %v2714_v38 = vld [vmem:[%s3601_s5 + $0xc0] sm:$0xff]   ;;  %v2733_v50 = vld [vmem:[%s3601_s5 + $0x108] sm:$0xff]  }
 0x2cd   : > { %2266 = vmatprep.subr.msk.bf16.mxu1 %vm670_vm7, %v2265_v39 }
 0x2cf   : > { %2340 = vmatpush3.bf16.msra.mxu0 %v2711_v33  ;;  %v2735_v33 = vld [vmem:[%s3601_s5 + $0x110] sm:$0xff]  }
 0x2d0   : > { %1311 = vmatpush1.bf16.msra.mxu1 %v1193_v41  ;;  %2341 = vmatprep.subr.bf16.mxu0 %v2712_v36  ;;  %v2736_v36 = vld [vmem:[%s3601_s5 + $0x158] sm:$0xff]  }
 0x2d3   : > { %2267 = vmatmul.mubr.msk.bf16.vlgmr.msra.gmra.mrb[0].mxu1 %vm1185_vm10, %v717_v54  ;;  %2342 = vmatpush3.bf16.msra.mxu0 %v2713_v37  ;;  %v2737_v37 = vld [vmem:[%s3601_s5 + $0x118] sm:$0xff]  }
 0x2d4   : > { %1342 = vmatprep.mubr.bf16.mxu1 %v2818_v14  ;;  %2349 = vmatprep.subr.bf16.mxu0 %v2714_v38  ;;  %v2738_v38 = vld [vmem:[%s3601_s5 + $0x160] sm:$0xff]  }
 0x2db   : > { %2268 = vmatmul.mubr.msk.bf16.gmra.mrb[4].mxu1 %vm1185_vm10, %v722_v45 }
 0x3a6   : > { %v1334_v52 = vpop.f32.mrb[0].mxu1 }
 0x3a7   : > { %v2415_v48 = vadd.f32 %v1334_v52, %v803_v43  ;;  %v1336_v40 = vpop.f32.mrb[1].mxu1 }
 0x3a8   : > { %v2416_v30 = vadd.f32 %v1336_v40, %v807_v42  ;;  %v1338_v51 = vpop.f32.mrb[2].mxu1 }
 0x3a9   : > { %v1351_v14 = vmax.f32 %v2415_v48, 0.0  ;;  %v2417_v53 = vadd.f32 %v1338_v51, %v803_v43  ;;  %v1340_v54 = vpop.f32.mrb[3].mxu1 }
 0x3aa   : > { %v1352_v55 = vmax.f32 %v2416_v30, 0.0  ;;  %v2418_v56 = vadd.f32 %v1340_v54, %v807_v42 }
 0x3ab   : > { %v1353_v46 = vmax.f32 %v2417_v53, 0.0  ;;  %v1363_v58 = vrot.slane %v1351_v14, 2 }
 0x3ac   : > { %v1354_v57 = vmax.f32 %v2418_v56, 0.0  ;;  %v1366_v47 = vrot.slane %v1352_v55, 2 }
 0x3ad   : > { %v1364_v59 = vrot.slane %v1353_v46, 2 }
 0x3ae   : > { %v1367_v62 = vrot.slane %v1354_v57, 2  ;;  %v1344_v61 = vpop.f32.mrb[4].mxu1 }
 0x3af   : > { %v2419_v0 = vadd.f32 %v1344_v61, %v803_v43  ;;  %v1346_v60 = vpop.f32.mrb[5].mxu1  ;;  %v1365_v63 = vsel %vm359_vm1, %v1363_v58, %v1364_v59  ;;  %v2715_v58 = vld [vmem:[%s3601_s5 + $0x80] sm:$0xff]   ;;  %v2717_v61 = vld [vmem:[%s3601_s5 + $0x88] sm:$0xff]  }
 0x3b0   : > { %v2420_v1 = vadd.f32 %v1346_v60, %v807_v42  ;;  %v1348_v2 = vpop.f32.mrb[6].mxu1  ;;  %v1368_v3 = vsel %vm359_vm1, %v1366_v47, %v1367_v62  ;;  %v1379_v4 = vmax.f32 %v1351_v14, %v1365_v63  ;;  %v2716_v47 = vld [vmem:[%s3601_s5 + $0xc8] sm:$0xff]   ;;  %v2718_v63 = vld [vmem:[%s3601_s5 + $0xd0] sm:$0xff]  }
 0x3b1   : > { %v1355_v5 = vmax.f32 %v2419_v0, 0.0  ;;  %v1349_v6 = vpop.f32.mrb[7].mxu1  ;;  %v1380_v7 = vmax.f32 %v1352_v55, %v1368_v3  ;;  %v2719_v3 = vld [vmem:[%s3601_s5 + $0x90] sm:$0xff]  }
 0x3b2   : > { %v1356_v8 = vmax.f32 %v2420_v1, 0.0 }
 0x3b3   : > { %v1369_v9 = vrot.slane %v1355_v5, 2  ;;  %v2548_v10 = vpack.i.bf16 %v1380_v7, %v1379_v4 }
 0x3b4   : > { %v1371_v11 = vrot.slane %v1356_v8, 2 }
 0x3b5   : > { %v3355_v12 = vmax.f32 %v1355_v5, %v1369_v9  ;;  %2549 = vrot.lane.b32.xlu0 %v2548_v10, %s2824_s27  ;;  %v1370_v13 = vsel %vm359_vm1, %v1364_v59, %v1369_v9  ;;  %v2720_v5 = vld [vmem:[%s3601_s5 + $0xd8] sm:$0xff]   ;;  %v2723_v10 = vld [vmem:[%s3601_s5 + $0xa0] sm:$0xff]  }
 0x3b6   : > { %v3359_v15 = vmax.f32 %v1356_v8, %v1371_v11  ;;  %v1372_v16 = vsel %vm359_vm1, %v1367_v62, %v1371_v11  ;;  %v1381_v17 = vmax.f32 %v1353_v46, %v1370_v13  ;;  %v2722_v8 = vld [vmem:[%s3601_s5 + $0xe0] sm:$0xff]   ;;  %v2724_v11 = vld [vmem:[%s3601_s5 + $0xe8] sm:$0xff]  }
 0x3b7   : > { %v1382_v18 = vmax.f32 %v1354_v57, %v1372_v16  ;;  %v2725_v16 = vld [vmem:[%s3601_s5 + $0xa8] sm:$0xff]  }
 0x3b8   : > { %v2563_v53 = vpack.i.bf16 %v3359_v15, %v3355_v12 }
 0x3b9   : > { %v2553_v19 = vpack.i.bf16 %v1382_v18, %v1381_v17 }
 0x3bb   : > { %2554 = vrot.lane.b32.xlu1 %v2553_v19, %s2824_s27 }
 0x427   : > { %v2550_v39 = vpop.permute.xlu0 %2549 }
 0x428   : > { %v2552_v32 = vunpack.i.h.bf16 %v2550_v39  ;;  %v2551_v41 = vunpack.i.l.bf16 %v2550_v39  ;;  %v2739_v39 = vld [vmem:[%s3601_s5 + $0x120] sm:$0xff]  }
 0x42a   : > { %v1404_v35 = vsel %vm1403_vm11, %v2551_v41, %v2552_v32  ;;  %v1414_v45 = vmax.f32 %v1380_v7, %v2552_v32  ;;  %v2721_v7 = vld [vmem:[%s3601_s5 + $0x98] sm:$0xff]   ;;  %v2740_v32 = vld [vmem:[%s3601_s5 + $0x168] sm:$0xff]  }
 0x42b   : > { %v1413_v44 = vmax.f32 %v1379_v4, %v1404_v35  ;;  %v2741_v41 = vld [vmem:[%s3601_s5 + $0x128] sm:$0xff]   ;;  %v2742_v35 = vld [vmem:[%s3601_s5 + $0x170] sm:$0xff]  }
 0x42c   : > { %v1422_v30 = vrot.slane %v1414_v45, 4 }
 0x42d   : > { %v2555_v26 = vpop.permute.xlu1 %2554  ;;  %v1421_v43 = vrot.slane %v1413_v44, 4  ;;  %v1454_v59 = vpack.c.bf16 %v1413_v44, %v1413_v44  ;;  %v2743_v44 = vld [vmem:[%s3601_s5 + $0x130] sm:$0xff]  }
 0x42e   : > { %v2557_v42 = vunpack.i.h.bf16 %v2555_v26  ;;  %v2556_v52 = vunpack.i.l.bf16 %v2555_v26 }
 0x42f   : > { %1423 = vrot.lane.b32.xlu0 %v1421_v43, %s2825_s29  ;;  %v2745_v43 = vld [vmem:[%s3601_s5 + $0x138] sm:$0xff]  }
 0x430   : > { %v1416_v48 = vmax.f32 %v1382_v18, %v2557_v42  ;;  %v1405_v40 = vsel %vm1403_vm11, %v2556_v52, %v2557_v42  ;;  %v2746_v52 = vld [vmem:[%s3601_s5 + $0x180] sm:$0xff]  }
 0x431   : > { %v1415_v51 = vmax.f32 %v1381_v17, %v1405_v40  ;;  %v2726_v17 = vld [vmem:[%s3601_s5 + $0xf0] sm:$0xff]   ;;  %v2828_v40 = vmov 0.0  }
 0x432   : > { %v1442_v55 = vrot.slane %v1416_v48, 4 }
 0x433   : > { %1425 = vrot.lane.b32.xlu0 %v1422_v30, %s2825_s29  ;;  %v2558_v14 = vpack.i.bf16 %v1416_v48, %v1415_v51  ;;  %v1441_v54 = vrot.slane %v1415_v51, 4  ;;  %v2747_v30 = vld [vmem:[%s3601_s5 + $0x188] sm:$0xff]   ;;  %s2102_s29 = scalar_lea.sflag [#allocation3], %s323_s22 }
 0x435   : > { %2559 = vrot.lane.b32.xlu1 %v2558_v14, %s2826_s14 }
 0x437   : > { %2564 = vrot.lane.b32.xlu0 %v2563_v53, %s2824_s27  ;;  %v2748_v53 = vld [vmem:[%s3603_s7] sm:$0xff]   ;;  %s324_s27 = scalar_lea.vmem [#allocation2], %s323_s22 }
 0x438   : > { %s2114_s24 = sshll.u32 %s324_s27, 4  ;;  %s3556_s24 = int_to_ptr.vmem [resolvable:$true] %s2114_s24 }
 0x439   : > { %1443 = vrot.lane.b32.xlu1 %v1441_v54, %s2827_s16  ;;  %v2749_v54 = vld [vmem:[%s3603_s7 + $0x8] sm:$0xff]   ;;  %s2754_s14 = scalar_lea.vmem %s3556_s24, 16 }
 0x43a   : > { %p2755_p11 = scmp.ne.s32.totalorder %s3556_s24, %s2754_s14 }
 0x43c   : > { %p2756_p12 = pnand %p2755_p11, %p2919_p5 }
 0x43d   : > { %1445 = vrot.lane.b32.xlu1 %v1442_v55, %s2827_s16  ;;  %s2758_s16 = sshll.u32 %s2830_s13, 4  ;;  %s2759_s16 = int_to_ptr.vmem [resolvable:$false] %s2758_s16 }
 0x43e   : > { %p2757_p13 = pneg %p2756_p12  ;;  %s2760_s17 = scalar_lea.vmem %s2759_s16, 32 }
 0x43f   : > { %p2761_p0 = scmp.lt.s32.totalorder %s3556_s24, %s2759_s16  ;;  %p2762_p1 = scmp.lt.s32.totalorder %s2760_s17, %s2754_s14 }
 0x441   : > { %p2763_p2 = por %p2762_p1, %p2761_p0 }
 0x443   : > { %p2764_p3 = pnand %p2763_p2, %p2757_p13 }
 0x4a1   : > { %v1424_v56 = vpop.permute.xlu0 %1423 }
 0x4a2   : > { %v1451_v46 = vsel %vm1427_vm12, %v1414_v45, %v1424_v56  ;;  %v2744_v45 = vld [vmem:[%s3601_s5 + $0x178] sm:$0xff]  }
 0x4a3   : > { %v1455_v57 = vpack.c.bf16 %v1451_v46, %v1451_v46 }
 0x4a5   : > { %1897 = vmatprep.mubr.bf16.mxu0 %v1455_v57  ;;  %v1426_v9 = vpop.permute.xlu0 %1425 }
 0x4a6   : > { %1898 = vmatmul.mubr.bf16.vlgmr.msra.gmra.mrb[8].mxu0 %v1454_v59  ;;  %v1428_v23 = vsel %vm1427_vm12, %v1424_v56, %v1426_v9 }
 0x4a7   : > { %2350 = vmatpush3.bf16.msra.mxu0 %v2715_v58  ;;  %v2560_v62 = vpop.permute.xlu1 %2559  ;;  %v1561_v58 = vld [vmem:[%s3602_s6] sm:$0x1] }
 0x4a8   : > { %v2562_v0 = vunpack.i.h.bf16 %v2560_v62  ;;  %v2561_v60 = vunpack.i.l.bf16 %v2560_v62  ;;  %2351 = vmatprep.subr.bf16.mxu0 %v2716_v47 }
 0x4a9   : > { %v3455_v13 = vpop.permute.xlu0 %2564 }
 0x4aa   : > { %v1438_v1 = vsel %vm1437_vm13, %v2561_v60, %v2562_v0  ;;  %v2567_v18 = vunpack.i.h.bf16 %v3455_v13  ;;  %v2566_v19 = vunpack.i.l.bf16 %v3455_v13  ;;  %v1452_v25 = vsel %vm1437_vm13, %v1428_v23, %v2561_v60 }
 0x4ab   : > { %2352 = vmatpush3.bf16.msra.mxu0 %v2717_v61  ;;  %v3433_v2 = vpop.permute.xlu1 %1443  ;;  %v1456_v31 = vpack.c.bf16 %v1452_v25, %v1452_v25 }
 0x4ac   : > { %v1453_v4 = vsel %vm1447_vm14, %v1438_v1, %v3433_v2  ;;  %2353 = vmatprep.subr.bf16.mxu0 %v2718_v63  ;;  %v1406_v21 = vsel %vm1403_vm11, %v2566_v19, %v2567_v18  ;;  %v1418_v51 = vmax.f32 %v3359_v15, %v2567_v18 }
 0x4ad   : > { %v1457_v6 = vpack.c.bf16 %v1453_v4, %v1453_v4  ;;  %v1417_v29 = vmax.f32 %v3355_v12, %v1406_v21  ;;  %v2734_v12 = vld [vmem:[%s3601_s5 + $0x150] sm:$0xff]  }
 0x4ae   : > { %v1460_v14 = vpack.c.bf16 %v1418_v51, %v1418_v51 }
 0x4af   : > { %2354 = vmatpush3.bf16.msra.mxu0 %v2719_v3  ;;  %1937 = vmatprep.mubr.bf16.mxu0 %v1457_v6  ;;  %v1459_v27 = vpack.c.bf16 %v1417_v29, %v1417_v29  ;;  %v1446_v26 = vpop.permute.xlu1 %1445 }
 0x4b0   : > { %2355 = vmatprep.subr.bf16.mxu0 %v2720_v5  ;;  %v1448_v42 = vsel %vm1447_vm14, %v3433_v2, %v1446_v26 }
 0x4b1   : > { %v1458_v48 = vpack.c.bf16 %v1448_v42, %v1448_v42 }
 0x4b3   : > { %2356 = vmatpush3.bf16.msra.mxu0 %v2721_v7 }
 0x4b4   : > { %2357 = vmatprep.subr.bf16.mxu0 %v2722_v8 }
 0x4b7   : > { %2358 = vmatpush3.bf16.msra.mxu0 %v2723_v10 }
 0x4b8   : > { %2359 = vmatprep.subr.bf16.mxu0 %v2724_v11 }
 0x4bb   : > { %2360 = vmatpush3.bf16.msra.mxu0 %v2725_v16 }
 0x4bc   : > { %2361 = vmatprep.subr.bf16.mxu0 %v2726_v17  ;;  %v2031_v17 = vld [vmem:[%s3604_s8] sm:$0x1] }
 0x4bf   : > { %2362 = vmatpush3.bf16.msra.mxu0 %v2727_v20 }
 0x4c0   : > { %2363 = vmatprep.subr.bf16.mxu0 %v2728_v49 }
 0x4c3   : > { %2364 = vmatpush3.bf16.msra.mxu0 %v2729_v22 }
 0x4c4   : > { %2371 = vmatprep.subr.bf16.mxu0 %v2730_v24 }
 0x4c6   : > { %1938 = vmatmul.mubr.bf16.vlgmr.msra.gmra.mrb[12].mxu0 %v1456_v31 }
 0x4c7   : > { %2372 = vmatpush3.bf16.msra.mxu0 %v2731_v28  ;;  %1977 = vmatprep.mubr.bf16.mxu0 %v1459_v27 }
 0x4c8   : > { %2373 = vmatprep.subr.bf16.mxu0 %v2732_v34 }
 0x4cb   : > { %2374 = vmatpush3.bf16.msra.mxu0 %v2733_v50 }
 0x4cc   : > { %2375 = vmatprep.subr.bf16.mxu0 %v2734_v12 }
 0x4cf   : > { %2376 = vmatpush3.bf16.msra.mxu0 %v2735_v33 }
 0x4d0   : > { %2377 = vmatprep.subr.bf16.mxu0 %v2736_v36 }
 0x4d3   : > { %2378 = vmatpush3.bf16.msra.mxu0 %v2737_v37 }
 0x4d4   : > { %2379 = vmatprep.subr.bf16.mxu0 %v2738_v38 }
 0x4d7   : > { %2380 = vmatpush3.bf16.msra.mxu0 %v2739_v39 }
 0x4d8   : > { %2381 = vmatprep.subr.bf16.mxu0 %v2740_v32 }
 0x4db   : > { %2382 = vmatpush3.bf16.msra.mxu0 %v2741_v41 }
 0x4dc   : > { %2383 = vmatprep.subr.bf16.mxu0 %v2742_v35 }
 0x4df   : > { %2384 = vmatpush3.bf16.msra.mxu0 %v2743_v44 }
 0x4e0   : > { %2385 = vmatprep.subr.bf16.mxu0 %v2744_v45 }
 0x4e3   : > { %2386 = vmatpush3.bf16.msra.mxu0 %v2745_v43 }
 0x4e4   : > { %2399 = vmatprep.subr.bf16.mxu0 %v2828_v40 }
 0x4e6   : > { %1978 = vmatmul.mubr.bf16.vlgmr.msra.gmra.mrb[16].mxu0 %v1458_v48 }
 0x4e7   : > { %2400 = vmatpush3.bf16.msra.mxu0 %v2746_v52  ;;  %2403 = vmatprep.mubr.msk.bf16.mxu0 %vm2829_vm15, %v2828_v40 }
 0x4e8   : > { %2401 = vmatprep.subr.bf16.mxu0 %v2828_v40 }
 0x4eb   : > { %2402 = vmatpush3.bf16.msra.mxu0 %v2747_v30 }
 0x4ec   : > { %2407 = vmatprep.subr.bf16.mxu0 %v2828_v40 }
 0x4ee   : > { %2404 = vmatmul.mubr.msk.bf16.vlgmr.msra.gmra.mrb[20].mxu0 %vm1427_vm12, %v1460_v14 }
 0x4ef   : > { %2411 = vmatprep.mubr.msk.bf16.mxu0 %vm2829_vm15, %v2828_v40  ;;  %2408 = vmatpush3.bf16.msra.mxu0 %v2748_v53 }
 0x4f0   : > { %2409 = vmatprep.subr.bf16.mxu0 %v2828_v40 }
 0x4f3   : > { %2410 = vmatpush3.bf16.msra.mxu0 %v2749_v54 }
 0x579   : > { %v2343_v55 = vpop.f32.mrb[8].mxu0 }
 0x57a   : > { %v2344_v15 = vpop.f32.mrb[9].mxu0 }
 0x57b   : > { %v2345_v56 = vadd.f32 %v2344_v15, %v2343_v55  ;;  %v2346_v46 = vpop.f32.mrb[10].mxu0 }
 0x57c   : > { %v2347_v57 = vpop.f32.mrb[11].mxu0 }
 0x57d   : > { %v1900_v62 = vadd.f32 %v2345_v56, %v1561_v58 }
 0x599   : > { %v2365_v59 = vpop.f32.mrb[12].mxu0 }
 0x59a   : > { %v2366_v47 = vpop.f32.mrb[13].mxu0 }
 0x59b   : > { %v2367_v61 = vadd.f32 %v2366_v47, %v2365_v59  ;;  %v2368_v0 = vpop.f32.mrb[14].mxu0 }
 0x59c   : > { %v2369_v60 = vpop.f32.mrb[15].mxu0 }
 0x59d   : > { %v1940_v63 = vadd.f32 %v2367_v61, %v1900_v62 }
 0x5b9   : > { %v2387_v1 = vpop.f32.mrb[16].mxu0 }
 0x5ba   : > { %v2388_v2 = vpop.f32.mrb[17].mxu0 }
 0x5bb   : > { %v2389_v3 = vadd.f32 %v2388_v2, %v2387_v1  ;;  %v2390_v4 = vpop.f32.mrb[18].mxu0 }
 0x5bc   : > { %v2391_v5 = vpop.f32.mrb[19].mxu0 }
 0x5bd   : > { %v1980_v6 = vadd.f32 %v2389_v3, %v1940_v63 }
 0x5c1   : > { %v2019_v7 = vpop.f32.mrb[20].mxu0 }
 0x5c2   : > { %v2020_v8 = vadd.f32 %v2019_v7, %v1980_v6  ;;  %v2405_v9 = vpop.f32.mrb[21].mxu0 }
 0x5c3   : > { %v2022_v10 = vpop.f32.mrb[22].mxu0 }
 0x5c4   : > { %v2025_v11 = vmax.f32 %v2020_v8, 0.0  ;;  %v2406_v13 = vpop.f32.mrb[23].mxu0 }
 0x5c6   : > { %v2026_v16 = vpack.c.bf16 %v2025_v11, %v2025_v11 }
 0x5c8   : > { %2412 = vmatmul.mubr.msk.bf16.vlgmr.msra.gmra.mrb[24].mxu0 %vm1427_vm12, %v2026_v16 }
 0x69b   : > { %v2081_v18 = vpop.f32.mrb[24].mxu0 }
 0x69c   : > { %v2082_v19 = vadd.f32 %v2081_v18, %v2031_v17  ;;  %v2413_v20 = vpop.f32.mrb[25].mxu0 }
 0x69d   : > { %v2084_v49 = vpop.f32.mrb[26].mxu0 }
 0x69e   : > { %v2414_v21 = vpop.f32.mrb[27].mxu0  ;;  %v2088_v22 = vsel %vm2087_vm0, %v2082_v19, -inf }
 0x69f   : > { %2089 = vmax.xlane.f32.xlu0 %v2088_v22 }
 0x72c   : > { %v2090_v23 = vpop.xlane.xlu0 %2089 }
 0x72d   : > { %v2091_v24 = vsub.f32 %v2082_v19, %v2090_v23 }
 0x72f   : > { %v2092_v25 = vmul.f32 1.442695, %v2091_v24 }
 0x731   : > { %2750 = vpow2.f32 %v2092_v25 }
 0x73b   : > { %v2751_v29 = vpop.eup %2750 }
 0x73c   : > { %v2094_v28 = vsel %vm2087_vm0, %v2751_v29, 0.0 }
 0x73d   : > { %2095 = vadd.xlane.f32.xlu1 %v2094_v28 }
 0x7ca   : > { %v2096_v31 = vpop.xlane.xlu1 %2095 }
 0x7cb   : > { %2752 = vlog2.f32 %v2096_v31 }
 0x7d5   : > { %v2753_v34 = vpop.eup %2752 }
 0x7d6   : > { %v2098_v27 = vmul.f32 0.6931472, %v2753_v34 }
 0x7d8   : > { %v2099_v50 = vsub.f32 %v2091_v24, %v2098_v27 }
 0x7da   : > { %2100 = vst [vmem:[%s324_s27] sm:$0x1] %v2099_v50 }
 0x7db   : > { %2767 = shalt.err (!%p2764_p3)
}
 0x7dc   : > { %s2768_s21 = scalar_lea.hbm %s3554_s28, 16  ;;  %s2772_s27 = scalar_lea.hbm %s3605_s9, 32 }
 0x7dd   : > { %p2769_p4 = scmp.ne.s32.totalorder %s3554_s28, %s2768_s21  ;;  %p2773_p9 = scmp.lt.u32.totalorder %s3554_s28, %s3605_s9 }
 0x7de   : > { %p2774_p10 = scmp.lt.u32.totalorder %s2772_s27, %s2768_s21  ;;  %p2776_p12 = scmp.lt.u32.totalorder %s2768_s21, %s3554_s28 }
 0x7df   : > { %p2770_p7 = pnand %p2769_p4, %p2919_p5 }
 0x7e0   : > { %p2775_p11 = por %p2774_p10, %p2773_p9 }
 0x7e1   : > { %p2771_p8 = pneg %p2770_p7 }
 0x7e2   : > { %p2777_p13 = por %p2776_p12, %p2775_p11 }
 0x7e4   : > { %p2778_p0 = pnand %p2777_p13, %p2771_p8 }
 0x7e6   : > { %2781 = shalt.err (!%p2778_p0)
}
 0x7e7   : > { %2437 = dma.vmem_to_hbm [thread:$0]  (%p2919_p5), %s3556_s24, 16, %s3554_s28, %s2102_s29  }
 0x7e8 PF: > { %p2443_p1 = scmp.ge.s32.totalorder %s2816_s12, 2  ;;  %s2126_s14 = sand.u32 1, %s2804_s30  }
 0x7e9   : > { %s2127_s13 = scalar_lea.sflag [#allocation3], %s2126_s14 }
 0x7ea   : > { %p2440_p2 = pnand %p2443_p1, %p2923_p6 }
 0x7ec   : > { %2799 = dma.done.wait (!%p2440_p2), %s2127_s13, 16  }
 0x7ed   : > { %2801 = vsyncadd (!%p2440_p2), %s2127_s13, 4294967280  ;;  %p19_p3 = scmp.ge.s32.totalorder %s2906_s15, 4   ;;  %s3608_s30 = smov %s2808_s10 }
 0x7ee   : > { %s3609_s10 = smov %s2812_s11  ;;  %s3610_s11 = smov %s2917_s18 }
 0x7ef   : > { %s3611_s12 = smov %s2906_s15  ;;  %21 = sbr.rel (!%p19_p3) target bundleno = 3 (0x3), region = 91 }
 0x7f6   :  { %2131 = vsyncpa [#allocation3], 1 }
 0x7f7   :  { %2133 = vsyncpa [#allocation3 + $0x1], 1 }

</bundles_post_ra>
